<compile_context>
chip_gen: v5e
topology: v5e:2x2
jax: 0.10.0
libtpu: 0.0.40
codegen_flags: <defaults>
</compile_context>

<pallas_src>
import functools

import jax
import jax.numpy as jnp
import numpy as np
from jax.experimental import pallas as pl
from jax.experimental.pallas import tpu as pltpu

BN_EPS = 1e-5


# --------------------------------------------------------------------------
# Fused Pallas kernel: (conv3x3 -> train-mode BN -> ReLU) x 2
# --------------------------------------------------------------------------
def double_conv_kernel(x_ref, w1_ref, w2_ref, bn_ref, mask_ref, o_ref,
                       pad2_ref, patch1_ref, patch2_ref, *, n_valid):
    # x_ref     : (Cin,  Lp)     flattened zero-padded input (+ lane margins)
    # w1_ref    : (Cout, 9*Cin)  conv1 weight, columns ordered (tap, cin)
    # w2_ref    : (Cout, 9*Cout) conv2 weight
    # bn_ref    : (Cout, 4)      packed columns [gamma1, beta1, gamma2, beta2]
    # mask_ref  : (1,    L0)     1.0 at valid pixels, 0.0 at conv-padding cols
    # o_ref     : (Cout, L0)     lane-dense output slab (junk at padding cols)
    # pad2_ref  : (Cout, Lp)     scratch: padded stage-1 activation (stays in VMEM)
    # patch1/2  : (9*C,  L0)     scratch: im2col matrices
    cin, lp = x_ref.shape
    cout, l0 = o_ref.shape
    wp = (lp - l0) // 2 - 1          # padded image width  (W + 2)
    inv_n = 1.0 / n_valid
    mask = mask_ref[...]             # (1, L0)

    def conv3x3(src_ref, patch_ref, w_ref, c):
        # im2col: tap (dy, dx) of the 3x3 stencil is the contiguous lane slice
        # starting at dy*wp + dx.  9 slices stacked on the contraction axis,
        # then a single MXU matmul (Cout, 9*C) @ (9*C, L0).
        for dy in range(3):
            for dx in range(3):
                t = dy * 3 + dx
                s = dy * wp + dx
                patch_ref[t * c:(t + 1) * c, :] = src_ref[:, s:s + l0]
        return jnp.dot(w_ref[...], patch_ref[...],
                       preferred_element_type=jnp.float32)

    def bn_relu(h, gamma, beta):
        # One-pass train-mode BatchNorm over the valid pixels only.
        hm = h * mask                                    # zero junk columns
        s = jnp.sum(hm, axis=1, keepdims=True)           # (Cout, 1)
        ss = jnp.sum(hm * h, axis=1, keepdims=True)      # sum of squares
        mean = s * inv_n
        var = jnp.maximum(ss * inv_n - mean * mean, 0.0)
        scale = gamma * jax.lax.rsqrt(var + BN_EPS)      # EUP rsqrt
        shift = beta - mean * scale
        return jnp.maximum(h * scale + shift, 0.0)       # fused scale/shift + ReLU

    # ---- stage 1: conv -> BN -> ReLU --------------------------------------
    h1 = conv3x3(x_ref, patch1_ref, w1_ref, cin)
    y1 = bn_relu(h1, bn_ref[:, 0:1], bn_ref[:, 1:2])

    # Stage-1 activation stays in VMEM, already laid out with conv padding:
    # zeroed margins + zeroed padding columns, valid pixels in the interior.
    pad2_ref[...] = jnp.zeros_like(pad2_ref)
    pad2_ref[:, wp + 1:wp + 1 + l0] = y1 * mask

    # ---- stage 2: conv -> BN -> ReLU --------------------------------------
    h2 = conv3x3(pad2_ref, patch2_ref, w2_ref, cout)
    y2 = bn_relu(h2, bn_ref[:, 2:3], bn_ref[:, 3:4])

    o_ref[...] = y2.astype(o_ref.dtype)


# --------------------------------------------------------------------------
# Wrapper: layout plumbing (tiny tensors, fused by XLA) + pallas_call
# --------------------------------------------------------------------------
def double_conv_forward(x, params):
    """x: (N, Cin, H, W) float32.  params: PyTorch-style double_conv params."""
    n, cin, h, w = x.shape
    w1 = params["w1"]                       # (Cout, Cin, 3, 3)   OIHW
    w2 = params["w2"]                       # (Cout, Cout, 3, 3)
    cout = w1.shape[0]
    hp, wp = h + 2, w + 2
    l0 = n * hp * wp                        # flattened padded spatial length
    lp = l0 + 2 * (wp + 1)                  # + margins: every tap = lane slice
    n_valid = n * h * w

    # Input: NCHW -> (Cin, N, Hp, Wp) -> flat (Cin, L0) -> margin-padded (Cin, Lp)
    xc = jnp.transpose(x.astype(jnp.float32), (1, 0, 2, 3))
    xc = jnp.pad(xc, ((0, 0), (0, 0), (1, 1), (1, 1)))          # conv padding=1
    xf = jnp.pad(xc.reshape(cin, l0), ((0, 0), (wp + 1, wp + 1)))

    # Conv weights as (Cout, 9*Cin), columns ordered (tap = dy*3+dx, cin) to
    # match the im2col row order built in the kernel.  (Conv biases are NOT
    # passed: train-mode BN mean-subtraction cancels them exactly.)
    w1r = jnp.transpose(w1, (0, 2, 3, 1)).reshape(cout, 9 * cin).astype(jnp.float32)
    w2r = jnp.transpose(w2, (0, 2, 3, 1)).reshape(cout, 9 * cout).astype(jnp.float32)

    # Pack both BN layers' affine params into a single (Cout, 4) operand.
    bn = jnp.stack([params["g1"], params["beta1"],
                    params["g2"], params["beta2"]], axis=1).astype(jnp.float32)

    # 0/1 mask of valid (non conv-padding) positions in the flat layout.
    m = np.zeros((n, hp, wp), np.float32)
    m[:, 1:hp - 1, 1:wp - 1] = 1.0
    mask = jnp.asarray(m.reshape(1, l0))

    kernel = functools.partial(double_conv_kernel, n_valid=n_valid)
    out2d = pl.pallas_call(
        kernel,
        out_shape=jax.ShapeDtypeStruct((cout, l0), jnp.float32),
        grid=(1,),
        in_specs=[
            pl.BlockSpec((cin, lp), lambda i: (0, 0)),
            pl.BlockSpec((cout, 9 * cin), lambda i: (0, 0)),
            pl.BlockSpec((cout, 9 * cout), lambda i: (0, 0)),
            pl.BlockSpec((cout, 4), lambda i: (0, 0)),
            pl.BlockSpec((1, l0), lambda i: (0, 0)),
        ],
        out_specs=pl.BlockSpec((cout, l0), lambda i: (0, 0)),
        scratch_shapes=[
            pltpu.VMEM((cout, lp), jnp.float32),        # padded stage-1 activation
            pltpu.VMEM((9 * cin, l0), jnp.float32),     # im2col matrix, conv1
            pltpu.VMEM((9 * cout, l0), jnp.float32),    # im2col matrix, conv2
        ],
        compiler_params=pltpu.CompilerParams(
            dimension_semantics=("arbitrary",)),
    )(xf, w1r, w2r, bn, mask)

    # Slice valid pixels out of the lane-dense slab and restore NCHW.
    y = out2d.reshape(cout, n, hp, wp)[:, :, 1:hp - 1, 1:wp - 1]
    return jnp.transpose(y, (1, 0, 2, 3))


# --------------------------------------------------------------------------
# Pure-JAX reference (matches PyTorch train-mode forward, incl. conv bias)
# --------------------------------------------------------------------------
def _conv_bn_relu_ref(x, w, b, gamma, beta):
    y = jax.lax.conv_general_dilated(
        x, w, window_strides=(1, 1), padding=((1, 1), (1, 1)),
        dimension_numbers=('NCHW', 'OIHW', 'NCHW'))
    y = y + b[None, :, None, None]
    mean = y.mean(axis=(0, 2, 3), keepdims=True)
    var = ((y - mean) ** 2).mean(axis=(0, 2, 3), keepdims=True)
    y = (y - mean) * jax.lax.rsqrt(var + BN_EPS)
    y = y * gamma[None, :, None, None] + beta[None, :, None, None]
    return jnp.maximum(y, 0.0)


def double_conv_ref(x, params):
    y = _conv_bn_relu_ref(x, params["w1"], params["b1"], params["g1"], params["beta1"])
    y = _conv_bn_relu_ref(y, params["w2"], params["b2"], params["g2"], params["beta2"])
    return y


# --------------------------------------------------------------------------
if __name__ == "__main__":
    key = jax.random.PRNGKey(0)
    kx, kw1, kb1, kg1, kbt1, kw2, kb2, kg2, kbt2 = jax.random.split(key, 9)

    # double_conv(in_ch=4, out_ch=8) on a (2, 4, 16, 16) input.
    N, in_ch, out_ch, H, W = 2, 4, 8, 16, 16
    x = jax.random.normal(kx, (N, in_ch, H, W), jnp.float32)

    params = {
        "w1": 0.1 * jax.random.normal(kw1, (out_ch, in_ch, 3, 3), jnp.float32),
        "b1": 0.1 * jax.random.normal(kb1, (out_ch,), jnp.float32),
        "g1": 1.0 + 0.1 * jax.random.normal(kg1, (out_ch,), jnp.float32),
        "beta1": 0.1 * jax.random.normal(kbt1, (out_ch,), jnp.float32),
        "w2": 0.1 * jax.random.normal(kw2, (out_ch, out_ch, 3, 3), jnp.float32),
        "b2": 0.1 * jax.random.normal(kb2, (out_ch,), jnp.float32),
        "g2": 1.0 + 0.1 * jax.random.normal(kg2, (out_ch,), jnp.float32),
        "beta2": 0.1 * jax.random.normal(kbt2, (out_ch,), jnp.float32),
    }

    out = jax.block_until_ready(jax.jit(double_conv_forward)(x, params))
    ref = jax.block_until_ready(double_conv_ref(x, params))

    assert out.shape == (N, out_ch, H, W), out.shape
    max_err = float(jnp.max(jnp.abs(out - ref)))
    assert jnp.allclose(out, ref, rtol=2e-3, atol=2e-3), max_err

    print("KERNEL_OK")
</pallas_src>

<mosaic_0001>
module attributes {stable_mosaic.version = 11 : i64} {
  func.func @double_conv_kernel(%arg0: i32, %arg1: memref<4x686xf32, #tpu.memory_space<vmem>>, %arg2: memref<8x36xf32, #tpu.memory_space<vmem>>, %arg3: memref<8x72xf32, #tpu.memory_space<vmem>>, %arg4: memref<8x4xf32, #tpu.memory_space<vmem>>, %arg5: memref<1x648xf32, #tpu.memory_space<vmem>>, %arg6: memref<8x648xf32, #tpu.memory_space<vmem>>, %arg7: memref<8x686xf32, #tpu.memory_space<vmem>>, %arg8: memref<36x648xf32, #tpu.memory_space<vmem>>, %arg9: memref<72x648xf32, #tpu.memory_space<vmem>>) attributes {dimension_semantics = [#tpu.dimension_semantics<arbitrary>], iteration_bounds = array<i64: 1>, scalar_prefetch = 0 : i64, scratch_operands = 3 : i64, tpu.core_type = #tpu.core_type<tc>, window_params = [{pipeline_mode = #tpu.pipeline_mode<synchronous>, transform_indices = @transform_0, window_bounds = array<i64: 4, 686>}, {pipeline_mode = #tpu.pipeline_mode<synchronous>, transform_indices = @transform_1, window_bounds = array<i64: 8, 36>}, {pipeline_mode = #tpu.pipeline_mode<synchronous>, transform_indices = @transform_2, window_bounds = array<i64: 8, 72>}, {pipeline_mode = #tpu.pipeline_mode<synchronous>, transform_indices = @transform_3, window_bounds = array<i64: 8, 4>}, {pipeline_mode = #tpu.pipeline_mode<synchronous>, transform_indices = @transform_4, window_bounds = array<i64: 1, 648>}, {pipeline_mode = #tpu.pipeline_mode<synchronous>, transform_indices = @transform_5, window_bounds = array<i64: 8, 648>}]} {
    %c0 = arith.constant 0 : index
    %c0_0 = arith.constant 0 : index
    %0 = vector.load %arg5[%c0, %c0_0] : memref<1x648xf32, #tpu.memory_space<vmem>>, vector<1x648xf32>
    %c0_1 = arith.constant 0 : index
    %c0_2 = arith.constant 0 : index
    %1 = vector.load %arg1[%c0_1, %c0_2] : memref<4x686xf32, #tpu.memory_space<vmem>>, vector<4x648xf32>
    %c0_3 = arith.constant 0 : index
    %c0_4 = arith.constant 0 : index
    %2 = vector.load %arg8[%c0_3, %c0_4] : memref<36x648xf32, #tpu.memory_space<vmem>>, vector<4x648xf32>
    tpu.vector_store %arg8[%c0_3, %c0_4], %1 {strides = array<i32>} : memref<36x648xf32, #tpu.memory_space<vmem>>, vector<4x648xf32>,
    %c0_5 = arith.constant 0 : index
    %c1 = arith.constant 1 : index
    %3 = vector.load %arg1[%c0_5, %c1] : memref<4x686xf32, #tpu.memory_space<vmem>>, vector<4x648xf32>
    %c4 = arith.constant 4 : index
    %c0_6 = arith.constant 0 : index
    %4 = vector.load %arg8[%c4, %c0_6] : memref<36x648xf32, #tpu.memory_space<vmem>>, vector<4x648xf32>
    tpu.vector_store %arg8[%c4, %c0_6], %3 {strides = array<i32>} : memref<36x648xf32, #tpu.memory_space<vmem>>, vector<4x648xf32>,
    %c0_7 = arith.constant 0 : index
    %c2 = arith.constant 2 : index
    %5 = vector.load %arg1[%c0_7, %c2] : memref<4x686xf32, #tpu.memory_space<vmem>>, vector<4x648xf32>
    %c8 = arith.constant 8 : index
    %c0_8 = arith.constant 0 : index
    %6 = vector.load %arg8[%c8, %c0_8] : memref<36x648xf32, #tpu.memory_space<vmem>>, vector<4x648xf32>
    tpu.vector_store %arg8[%c8, %c0_8], %5 {strides = array<i32>} : memref<36x648xf32, #tpu.memory_space<vmem>>, vector<4x648xf32>,
    %c0_9 = arith.constant 0 : index
    %c18 = arith.constant 18 : index
    %7 = vector.load %arg1[%c0_9, %c18] : memref<4x686xf32, #tpu.memory_space<vmem>>, vector<4x648xf32>
    %c12 = arith.constant 12 : index
    %c0_10 = arith.constant 0 : index
    %8 = vector.load %arg8[%c12, %c0_10] : memref<36x648xf32, #tpu.memory_space<vmem>>, vector<4x648xf32>
    tpu.vector_store %arg8[%c12, %c0_10], %7 {strides = array<i32>} : memref<36x648xf32, #tpu.memory_space<vmem>>, vector<4x648xf32>,
    %c0_11 = arith.constant 0 : index
    %c19 = arith.constant 19 : index
    %9 = vector.load %arg1[%c0_11, %c19] : memref<4x686xf32, #tpu.memory_space<vmem>>, vector<4x648xf32>
    %c16 = arith.constant 16 : index
    %c0_12 = arith.constant 0 : index
    %10 = vector.load %arg8[%c16, %c0_12] : memref<36x648xf32, #tpu.memory_space<vmem>>, vector<4x648xf32>
    tpu.vector_store %arg8[%c16, %c0_12], %9 {strides = array<i32>} : memref<36x648xf32, #tpu.memory_space<vmem>>, vector<4x648xf32>,
    %c0_13 = arith.constant 0 : index
    %c20 = arith.constant 20 : index
    %11 = vector.load %arg1[%c0_13, %c20] : memref<4x686xf32, #tpu.memory_space<vmem>>, vector<4x648xf32>
    %c20_14 = arith.constant 20 : index
    %c0_15 = arith.constant 0 : index
    %12 = vector.load %arg8[%c20_14, %c0_15] : memref<36x648xf32, #tpu.memory_space<vmem>>, vector<4x648xf32>
    tpu.vector_store %arg8[%c20_14, %c0_15], %11 {strides = array<i32>} : memref<36x648xf32, #tpu.memory_space<vmem>>, vector<4x648xf32>,
    %c0_16 = arith.constant 0 : index
    %c36 = arith.constant 36 : index
    %13 = vector.load %arg1[%c0_16, %c36] : memref<4x686xf32, #tpu.memory_space<vmem>>, vector<4x648xf32>
    %c24 = arith.constant 24 : index
    %c0_17 = arith.constant 0 : index
    %14 = vector.load %arg8[%c24, %c0_17] : memref<36x648xf32, #tpu.memory_space<vmem>>, vector<4x648xf32>
    tpu.vector_store %arg8[%c24, %c0_17], %13 {strides = array<i32>} : memref<36x648xf32, #tpu.memory_space<vmem>>, vector<4x648xf32>,
    %c0_18 = arith.constant 0 : index
    %c37 = arith.constant 37 : index
    %15 = vector.load %arg1[%c0_18, %c37] : memref<4x686xf32, #tpu.memory_space<vmem>>, vector<4x648xf32>
    %c28 = arith.constant 28 : index
    %c0_19 = arith.constant 0 : index
    %16 = vector.load %arg8[%c28, %c0_19] : memref<36x648xf32, #tpu.memory_space<vmem>>, vector<4x648xf32>
    tpu.vector_store %arg8[%c28, %c0_19], %15 {strides = array<i32>} : memref<36x648xf32, #tpu.memory_space<vmem>>, vector<4x648xf32>,
    %c0_20 = arith.constant 0 : index
    %c38 = arith.constant 38 : index
    %17 = vector.load %arg1[%c0_20, %c38] : memref<4x686xf32, #tpu.memory_space<vmem>>, vector<4x648xf32>
    %c32 = arith.constant 32 : index
    %c0_21 = arith.constant 0 : index
    %18 = vector.load %arg8[%c32, %c0_21] : memref<36x648xf32, #tpu.memory_space<vmem>>, vector<4x648xf32>
    tpu.vector_store %arg8[%c32, %c0_21], %17 {strides = array<i32>} : memref<36x648xf32, #tpu.memory_space<vmem>>, vector<4x648xf32>,
    %c0_22 = arith.constant 0 : index
    %c0_23 = arith.constant 0 : index
    %19 = vector.load %arg2[%c0_22, %c0_23] : memref<8x36xf32, #tpu.memory_space<vmem>>, vector<8x36xf32>
    %c0_24 = arith.constant 0 : index
    %c0_25 = arith.constant 0 : index
    %20 = vector.load %arg8[%c0_24, %c0_25] : memref<36x648xf32, #tpu.memory_space<vmem>>, vector<36x648xf32>
    %cst = arith.constant dense<0.000000e+00> : vector<8x648xf32>
    %21 = tpu.matmul %19, %20, %cst {dimension_numbers = #tpu.dot_dimension_numbers<[1], [0], [0], [1], [0, 0, 1, 1], [], []>} : vector<8x36xf32>, vector<36x648xf32>, vector<8x648xf32> -> vector<8x648xf32>
    %c0_26 = arith.constant 0 : index
    %c0_27 = arith.constant 0 : index
    %22 = vector.load %arg4[%c0_26, %c0_27] : memref<8x4xf32, #tpu.memory_space<vmem>>, vector<8x1xf32>
    %c0_28 = arith.constant 0 : index
    %c1_29 = arith.constant 1 : index
    %23 = vector.load %arg4[%c0_28, %c1_29] : memref<8x4xf32, #tpu.memory_space<vmem>>, vector<8x1xf32>
    %24 = vector.broadcast %0 : vector<1x648xf32> to vector<8x648xf32>
    %25 = arith.mulf %21, %24 : vector<8x648xf32>
    %cst_30 = arith.constant dense<0.000000e+00> : vector<8xf32>
    %26 = vector.multi_reduction <add>, %25, %cst_30 [1] : vector<8x648xf32> to vector<8xf32>
    %27 = vector.shape_cast %26 : vector<8xf32> to vector<8x1xf32>
    %28 = arith.mulf %25, %21 : vector<8x648xf32>
    %cst_31 = arith.constant dense<0.000000e+00> : vector<8xf32>
    %29 = vector.multi_reduction <add>, %28, %cst_31 [1] : vector<8x648xf32> to vector<8xf32>
    %30 = vector.shape_cast %29 : vector<8xf32> to vector<8x1xf32>
    %cst_32 = arith.constant 0.001953125 : f32
    %31 = vector.broadcast %cst_32 : f32 to vector<8x1xf32>
    %32 = arith.mulf %27, %31 : vector<8x1xf32>
    %cst_33 = arith.constant 0.001953125 : f32
    %33 = vector.broadcast %cst_33 : f32 to vector<8x1xf32>
    %34 = arith.mulf %30, %33 : vector<8x1xf32>
    %35 = arith.mulf %32, %32 : vector<8x1xf32>
    %36 = arith.subf %34, %35 : vector<8x1xf32>
    %cst_34 = arith.constant 0.000000e+00 : f32
    %37 = vector.broadcast %cst_34 : f32 to vector<8x1xf32>
    %38 = arith.maximumf %36, %37 : vector<8x1xf32>
    %cst_35 = arith.constant 9.99999974E-6 : f32
    %39 = vector.broadcast %cst_35 : f32 to vector<8x1xf32>
    %40 = arith.addf %38, %39 : vector<8x1xf32>
    %41 = math.rsqrt %40 : vector<8x1xf32>
    %42 = arith.mulf %22, %41 : vector<8x1xf32>
    %43 = arith.mulf %32, %42 : vector<8x1xf32>
    %44 = arith.subf %23, %43 : vector<8x1xf32>
    %45 = vector.broadcast %42 : vector<8x1xf32> to vector<8x648xf32>
    %46 = arith.mulf %21, %45 : vector<8x648xf32>
    %47 = vector.broadcast %44 : vector<8x1xf32> to vector<8x648xf32>
    %48 = arith.addf %46, %47 : vector<8x648xf32>
    %cst_36 = arith.constant 0.000000e+00 : f32
    %49 = vector.broadcast %cst_36 : f32 to vector<8x648xf32>
    %50 = arith.maximumf %48, %49 : vector<8x648xf32>
    %cst_37 = arith.constant 0.000000e+00 : f32
    %51 = vector.broadcast %cst_37 : f32 to vector<8x686xf32>
    %c0_38 = arith.constant 0 : index
    %c0_39 = arith.constant 0 : index
    %52 = vector.load %arg7[%c0_38, %c0_39] : memref<8x686xf32, #tpu.memory_space<vmem>>, vector<8x686xf32>
    tpu.vector_store %arg7[%c0_38, %c0_39], %51 {strides = array<i32>} : memref<8x686xf32, #tpu.memory_space<vmem>>, vector<8x686xf32>,
    %53 = vector.broadcast %0 : vector<1x648xf32> to vector<8x648xf32>
    %54 = arith.mulf %50, %53 : vector<8x648xf32>
    %c0_40 = arith.constant 0 : index
    %c19_41 = arith.constant 19 : index
    %55 = vector.load %arg7[%c0_40, %c19_41] : memref<8x686xf32, #tpu.memory_space<vmem>>, vector<8x648xf32>
    tpu.vector_store %arg7[%c0_40, %c19_41], %54 {strides = array<i32>} : memref<8x686xf32, #tpu.memory_space<vmem>>, vector<8x648xf32>,
    %c0_42 = arith.constant 0 : index
    %c0_43 = arith.constant 0 : index
    %56 = vector.load %arg7[%c0_42, %c0_43] : memref<8x686xf32, #tpu.memory_space<vmem>>, vector<8x648xf32>
    %c0_44 = arith.constant 0 : index
    %c0_45 = arith.constant 0 : index
    %57 = vector.load %arg9[%c0_44, %c0_45] : memref<72x648xf32, #tpu.memory_space<vmem>>, vector<8x648xf32>
    tpu.vector_store %arg9[%c0_44, %c0_45], %56 {strides = array<i32>} : memref<72x648xf32, #tpu.memory_space<vmem>>, vector<8x648xf32>,
    %c0_46 = arith.constant 0 : index
    %c1_47 = arith.constant 1 : index
    %58 = vector.load %arg7[%c0_46, %c1_47] : memref<8x686xf32, #tpu.memory_space<vmem>>, vector<8x648xf32>
    %c8_48 = arith.constant 8 : index
    %c0_49 = arith.constant 0 : index
    %59 = vector.load %arg9[%c8_48, %c0_49] : memref<72x648xf32, #tpu.memory_space<vmem>>, vector<8x648xf32>
    tpu.vector_store %arg9[%c8_48, %c0_49], %58 {strides = array<i32>} : memref<72x648xf32, #tpu.memory_space<vmem>>, vector<8x648xf32>,
    %c0_50 = arith.constant 0 : index
    %c2_51 = arith.constant 2 : index
    %60 = vector.load %arg7[%c0_50, %c2_51] : memref<8x686xf32, #tpu.memory_space<vmem>>, vector<8x648xf32>
    %c16_52 = arith.constant 16 : index
    %c0_53 = arith.constant 0 : index
    %61 = vector.load %arg9[%c16_52, %c0_53] : memref<72x648xf32, #tpu.memory_space<vmem>>, vector<8x648xf32>
    tpu.vector_store %arg9[%c16_52, %c0_53], %60 {strides = array<i32>} : memref<72x648xf32, #tpu.memory_space<vmem>>, vector<8x648xf32>,
    %c0_54 = arith.constant 0 : index
    %c18_55 = arith.constant 18 : index
    %62 = vector.load %arg7[%c0_54, %c18_55] : memref<8x686xf32, #tpu.memory_space<vmem>>, vector<8x648xf32>
    %c24_56 = arith.constant 24 : index
    %c0_57 = arith.constant 0 : index
    %63 = vector.load %arg9[%c24_56, %c0_57] : memref<72x648xf32, #tpu.memory_space<vmem>>, vector<8x648xf32>
    tpu.vector_store %arg9[%c24_56, %c0_57], %62 {strides = array<i32>} : memref<72x648xf32, #tpu.memory_space<vmem>>, vector<8x648xf32>,
    %c0_58 = arith.constant 0 : index
    %c19_59 = arith.constant 19 : index
    %64 = vector.load %arg7[%c0_58, %c19_59] : memref<8x686xf32, #tpu.memory_space<vmem>>, vector<8x648xf32>
    %c32_60 = arith.constant 32 : index
    %c0_61 = arith.constant 0 : index
    %65 = vector.load %arg9[%c32_60, %c0_61] : memref<72x648xf32, #tpu.memory_space<vmem>>, vector<8x648xf32>
    tpu.vector_store %arg9[%c32_60, %c0_61], %64 {strides = array<i32>} : memref<72x648xf32, #tpu.memory_space<vmem>>, vector<8x648xf32>,
    %c0_62 = arith.constant 0 : index
    %c20_63 = arith.constant 20 : index
    %66 = vector.load %arg7[%c0_62, %c20_63] : memref<8x686xf32, #tpu.memory_space<vmem>>, vector<8x648xf32>
    %c40 = arith.constant 40 : index
    %c0_64 = arith.constant 0 : index
    %67 = vector.load %arg9[%c40, %c0_64] : memref<72x648xf32, #tpu.memory_space<vmem>>, vector<8x648xf32>
    tpu.vector_store %arg9[%c40, %c0_64], %66 {strides = array<i32>} : memref<72x648xf32, #tpu.memory_space<vmem>>, vector<8x648xf32>,
    %c0_65 = arith.constant 0 : index
    %c36_66 = arith.constant 36 : index
    %68 = vector.load %arg7[%c0_65, %c36_66] : memref<8x686xf32, #tpu.memory_space<vmem>>, vector<8x648xf32>
    %c48 = arith.constant 48 : index
    %c0_67 = arith.constant 0 : index
    %69 = vector.load %arg9[%c48, %c0_67] : memref<72x648xf32, #tpu.memory_space<vmem>>, vector<8x648xf32>
    tpu.vector_store %arg9[%c48, %c0_67], %68 {strides = array<i32>} : memref<72x648xf32, #tpu.memory_space<vmem>>, vector<8x648xf32>,
    %c0_68 = arith.constant 0 : index
    %c37_69 = arith.constant 37 : index
    %70 = vector.load %arg7[%c0_68, %c37_69] : memref<8x686xf32, #tpu.memory_space<vmem>>, vector<8x648xf32>
    %c56 = arith.constant 56 : index
    %c0_70 = arith.constant 0 : index
    %71 = vector.load %arg9[%c56, %c0_70] : memref<72x648xf32, #tpu.memory_space<vmem>>, vector<8x648xf32>
    tpu.vector_store %arg9[%c56, %c0_70], %70 {strides = array<i32>} : memref<72x648xf32, #tpu.memory_space<vmem>>, vector<8x648xf32>,
    %c0_71 = arith.constant 0 : index
    %c38_72 = arith.constant 38 : index
    %72 = vector.load %arg7[%c0_71, %c38_72] : memref<8x686xf32, #tpu.memory_space<vmem>>, vector<8x648xf32>
    %c64 = arith.constant 64 : index
    %c0_73 = arith.constant 0 : index
    %73 = vector.load %arg9[%c64, %c0_73] : memref<72x648xf32, #tpu.memory_space<vmem>>, vector<8x648xf32>
    tpu.vector_store %arg9[%c64, %c0_73], %72 {strides = array<i32>} : memref<72x648xf32, #tpu.memory_space<vmem>>, vector<8x648xf32>,
    %c0_74 = arith.constant 0 : index
    %c0_75 = arith.constant 0 : index
    %74 = vector.load %arg3[%c0_74, %c0_75] : memref<8x72xf32, #tpu.memory_space<vmem>>, vector<8x72xf32>
    %c0_76 = arith.constant 0 : index
    %c0_77 = arith.constant 0 : index
    %75 = vector.load %arg9[%c0_76, %c0_77] : memref<72x648xf32, #tpu.memory_space<vmem>>, vector<72x648xf32>
    %cst_78 = arith.constant dense<0.000000e+00> : vector<8x648xf32>
    %76 = tpu.matmul %74, %75, %cst_78 {dimension_numbers = #tpu.dot_dimension_numbers<[1], [0], [0], [1], [0, 0, 1, 1], [], []>} : vector<8x72xf32>, vector<72x648xf32>, vector<8x648xf32> -> vector<8x648xf32>
    %c0_79 = arith.constant 0 : index
    %c2_80 = arith.constant 2 : index
    %77 = vector.load %arg4[%c0_79, %c2_80] : memref<8x4xf32, #tpu.memory_space<vmem>>, vector<8x1xf32>
    %c0_81 = arith.constant 0 : index
    %c3 = arith.constant 3 : index
    %78 = vector.load %arg4[%c0_81, %c3] : memref<8x4xf32, #tpu.memory_space<vmem>>, vector<8x1xf32>
    %79 = vector.broadcast %0 : vector<1x648xf32> to vector<8x648xf32>
    %80 = arith.mulf %76, %79 : vector<8x648xf32>
    %cst_82 = arith.constant dense<0.000000e+00> : vector<8xf32>
    %81 = vector.multi_reduction <add>, %80, %cst_82 [1] : vector<8x648xf32> to vector<8xf32>
    %82 = vector.shape_cast %81 : vector<8xf32> to vector<8x1xf32>
    %83 = arith.mulf %80, %76 : vector<8x648xf32>
    %cst_83 = arith.constant dense<0.000000e+00> : vector<8xf32>
    %84 = vector.multi_reduction <add>, %83, %cst_83 [1] : vector<8x648xf32> to vector<8xf32>
    %85 = vector.shape_cast %84 : vector<8xf32> to vector<8x1xf32>
    %cst_84 = arith.constant 0.001953125 : f32
    %86 = vector.broadcast %cst_84 : f32 to vector<8x1xf32>
    %87 = arith.mulf %82, %86 : vector<8x1xf32>
    %cst_85 = arith.constant 0.001953125 : f32
    %88 = vector.broadcast %cst_85 : f32 to vector<8x1xf32>
    %89 = arith.mulf %85, %88 : vector<8x1xf32>
    %90 = arith.mulf %87, %87 : vector<8x1xf32>
    %91 = arith.subf %89, %90 : vector<8x1xf32>
    %cst_86 = arith.constant 0.000000e+00 : f32
    %92 = vector.broadcast %cst_86 : f32 to vector<8x1xf32>
    %93 = arith.maximumf %91, %92 : vector<8x1xf32>
    %cst_87 = arith.constant 9.99999974E-6 : f32
    %94 = vector.broadcast %cst_87 : f32 to vector<8x1xf32>
    %95 = arith.addf %93, %94 : vector<8x1xf32>
    %96 = math.rsqrt %95 : vector<8x1xf32>
    %97 = arith.mulf %77, %96 : vector<8x1xf32>
    %98 = arith.mulf %87, %97 : vector<8x1xf32>
    %99 = arith.subf %78, %98 : vector<8x1xf32>
    %100 = vector.broadcast %97 : vector<8x1xf32> to vector<8x648xf32>
    %101 = arith.mulf %76, %100 : vector<8x648xf32>
    %102 = vector.broadcast %99 : vector<8x1xf32> to vector<8x648xf32>
    %103 = arith.addf %101, %102 : vector<8x648xf32>
    %cst_88 = arith.constant 0.000000e+00 : f32
    %104 = vector.broadcast %cst_88 : f32 to vector<8x648xf32>
    %105 = arith.maximumf %103, %104 : vector<8x648xf32>
    %c0_89 = arith.constant 0 : index
    %c0_90 = arith.constant 0 : index
    %106 = vector.load %arg6[%c0_89, %c0_90] : memref<8x648xf32, #tpu.memory_space<vmem>>, vector<8x648xf32>
    tpu.vector_store %arg6[%c0_89, %c0_90], %105 {strides = array<i32>} : memref<8x648xf32, #tpu.memory_space<vmem>>, vector<8x648xf32>,
    return
  }
  func.func @transform_0(%arg0: i32) -> (i32, i32) {
    %c0_i32 = arith.constant 0 : i32
    %c0_i32_0 = arith.constant 0 : i32
    %c0_i32_1 = arith.constant 0 : i32
    return %c0_i32, %c0_i32_0 : i32, i32
  }
  func.func @transform_1(%arg0: i32) -> (i32, i32) {
    %c0_i32 = arith.constant 0 : i32
    %c0_i32_0 = arith.constant 0 : i32
    %c0_i32_1 = arith.constant 0 : i32
    return %c0_i32, %c0_i32_0 : i32, i32
  }
  func.func @transform_2(%arg0: i32) -> (i32, i32) {
    %c0_i32 = arith.constant 0 : i32
    %c0_i32_0 = arith.constant 0 : i32
    %c0_i32_1 = arith.constant 0 : i32
    return %c0_i32, %c0_i32_0 : i32, i32
  }
  func.func @transform_3(%arg0: i32) -> (i32, i32) {
    %c0_i32 = arith.constant 0 : i32
    %c0_i32_0 = arith.constant 0 : i32
    %c0_i32_1 = arith.constant 0 : i32
    return %c0_i32, %c0_i32_0 : i32, i32
  }
  func.func @transform_4(%arg0: i32) -> (i32, i32) {
    %c0_i32 = arith.constant 0 : i32
    %c0_i32_0 = arith.constant 0 : i32
    %c0_i32_1 = arith.constant 0 : i32
    return %c0_i32, %c0_i32_0 : i32, i32
  }
  func.func @transform_5(%arg0: i32) -> (i32, i32) {
    %c0_i32 = arith.constant 0 : i32
    %c0_i32_0 = arith.constant 0 : i32
    %c0_i32_1 = arith.constant 0 : i32
    return %c0_i32, %c0_i32_0 : i32, i32
  }
}

</mosaic_0001>

<bundles_post_ra>
// kernel: double_conv_forward.1
= control target key start
LH: loop header
LB: loop body
LE: loop exit
PB: predicated region body
PF: predicated region fallthrough
CT: control target
= control target key end

     0   :  { %s1403_s24 = smov 126   ;;  %s1404_s25 = smov 110   ;;  %vm129_vm0 = vcmask 1031168   ;;  %vm177_vm1 = vcmask 900096   ;;  %vm224_vm2 = vcmask 891904   ;;  %vm272_vm3 = vcmask 883712   ;;  %s1995_s0 = inlined_call_operand.vmem [shape: f32[4,686], index: 0, kind: input, shape index: {}]   ;;  %s1996_s1 = inlined_call_operand.vmem [shape: f32[8,36], index: 1, kind: input, shape index: {}]   ;;  %s1997_s4 = inlined_call_operand.vmem [shape: f32[1,648], index: 4, kind: input, shape index: {}]   ;;  %s1998_s3 = inlined_call_operand.vmem [shape: f32[8,4], index: 3, kind: input, shape index: {}]   ;;  %s1999_s2 = inlined_call_operand.vmem [shape: f32[8,72], index: 2, kind: input, shape index: {}]   ;;  %s2000_s5 = inlined_call_operand.vmem [shape: f32[8,648], index: 5, kind: output, shape index: {}]  }
   0x1   :  { %v1450_v0 = vld [vmem:[%s1995_s0 + $0x8] sm:$0xff]  ;;  %v1455_v1 = vld [vmem:[%s1995_s0] sm:$0xff]  ;;  %v1460_v2 = vld [vmem:[%s1995_s0 + $0x10] sm:$0xff]  ;;  %s1402_s0 = smov 127   ;;  %s1405_s26 = smov 109   ;;  %vm367_vm4 = vcmask 744448  }
   0x2   :  { %29 = vst [vmem:[#allocation1 + $0x10] ss:$2 sm:$0xff] %v1450_v0  ;;  %s1406_s27 = smov 108   ;;  %s1407_s28 = smov 92   ;;  %vm319_vm5 = vcmask 752640   ;;  %vm49_vm6 = vcmask 60416  }
   0x3   :  { %27 = vst [vmem:[#allocation1] ss:$2 sm:$0xff] %v1455_v1  ;;  %s1408_s29 = smov 91   ;;  %s1409_s30 = smov 90   ;;  %vm414_vm7 = vcmask 736256   ;;  %vm81_vm8 = vcmask 1039360  }
   0x4   :  { %31 = vst [vmem:[#allocation1 + $0x20] ss:$2 sm:$0xff] %v1460_v2  ;;  %vm467_vm9 = vcmask 1043456   ;;  %vm98_vm10 = vcmask 64516   ;;  %vm463_vm11 = vcmask 293888   ;;  %vm630_vm12 = vcmask 64512  }
   0x5   :  { %s1411_s10 = smov 1  }
   0x9   :  { %v34_v3 = vld.sshfl [vmem:[#allocation1 + $0x10] sm:$0xff pattern:$0x75316420]  ;;  %v35_v4 = vld.sshfl [vmem:[#allocation1 + $0x18] sm:$0xff pattern:$0x75316420] }
   0xa   :  { %60 = vst [vmem:[#allocation1 + $0x11] ss:$2 sm:$0xff] %v1450_v0  ;;  %v32_v5 = vld.sshfl [vmem:[#allocation1] sm:$0xff pattern:$0x75316420] }
   0xb   :  { %46 = vst [vmem:[#allocation3 + $0x10] sm:$0xf] %v34_v3  ;;  %v33_v6 = vld.sshfl [vmem:[#allocation1 + $0x8] sm:$0xff pattern:$0x75316420] }
   0xc   :  { %47 = vst [vmem:[#allocation3 + $0x18] sm:$0xf] %v35_v4  ;;  %v36_v7 = vld.sshfl [vmem:[#allocation1 + $0x20] sm:$0xff pattern:$0x75316420] }
   0xd   :  { %58 = vst [vmem:[#allocation1 + $0x1] ss:$2 sm:$0xff] %v1455_v1  ;;  %v1467_v8 = vld.sshfl [vmem:[#allocation1 + $0x28] sm:$0xff pattern:$0x75316420] }
   0xe   :  { %44 = vst [vmem:[#allocation3] sm:$0xf] %v32_v5 }
   0xf   :  { %45 = vst [vmem:[#allocation3 + $0x8] sm:$0xf] %v33_v6 }
  0x10   :  { %62 = vst [vmem:[#allocation1 + $0x21] ss:$2 sm:$0xff] %v1460_v2 }
  0x11   :  { %v65_v9 = vld.sshfl [vmem:[#allocation1 + $0x10] sm:$0xff pattern:$0x75316420]  ;;  %v1470_v10 = vld.sshfl [vmem:[#allocation1 + $0x18] sm:$0xff pattern:$0x75316420] }
  0x12   :  { %73 = vrot.lane.b32.xlu2 %v65_v9, %s1402_s0  ;;  %108 = vst [vmem:[#allocation1 + $0x10] ss:$2 sm:$0xff] %v1450_v0 }
  0x13   :  { %48 = vst [vmem:[#allocation3 + $0x20] sm:$0xf] %v36_v7 }
  0x14   :  { %v1474_v11 = vld.sshfl [vmem:[#allocation1] sm:$0xff pattern:$0x75316420]  ;;  %v1476_v12 = vld.sshfl [vmem:[#allocation1 + $0x8] sm:$0xff pattern:$0x75316420] }
  0x15   :  { %106 = vst [vmem:[#allocation1] ss:$2 sm:$0xff] %v1455_v1 }
  0x16   :  { %50 = vst.msk [vmem:[#allocation3 + $0x28] sm:$0xf] %vm49_vm6, %v1467_v8 }
  0x17   :  { %v1479_v13 = vld.sshfl [vmem:[#allocation1 + $0x20] sm:$0xff pattern:$0x75316420]  ;;  %v1481_v14 = vld.sshfl [vmem:[#allocation1 + $0x28] sm:$0xff pattern:$0x75316420] }
  0x18   :  { %110 = vst [vmem:[#allocation1 + $0x20] ss:$2 sm:$0xff] %v1460_v2 }
  0x19   :  { %v113_v15 = vld.sshfl [vmem:[#allocation1 + $0x10] sm:$0xff pattern:$0x75316420]  ;;  %v114_v16 = vld.sshfl [vmem:[#allocation1 + $0x18] sm:$0xff pattern:$0x75316420] }
  0x1a   :  { %121 = vrot.lane.b32.xlu1 %v113_v15, %s1403_s24  ;;  %123 = vrot.lane.b32.xlu2 %v114_v16, %s1403_s24  ;;  %156 = vst [vmem:[#allocation1 + $0x11] ss:$2 sm:$0xff] %v1450_v0 }
  0x1c   :  { %v1487_v17 = vld.sshfl [vmem:[#allocation1] sm:$0xff pattern:$0x75316420]  ;;  %v1489_v18 = vld.sshfl [vmem:[#allocation1 + $0x8] sm:$0xff pattern:$0x75316420] }
  0x1d   :  { %154 = vst [vmem:[#allocation1 + $0x1] ss:$2 sm:$0xff] %v1455_v1 }
  0x1f   :  { %v1492_v19 = vld.sshfl [vmem:[#allocation1 + $0x20] sm:$0xff pattern:$0x75316420]  ;;  %v1494_v20 = vld.sshfl [vmem:[#allocation1 + $0x28] sm:$0xff pattern:$0x75316420] }
  0x20   :  { %158 = vst [vmem:[#allocation1 + $0x21] ss:$2 sm:$0xff] %v1460_v2 }
  0x21   :  { %v162_v21 = vld.sshfl [vmem:[#allocation1 + $0x18] sm:$0xff pattern:$0x75316420]  ;;  %v161_v22 = vld.sshfl [vmem:[#allocation1 + $0x10] sm:$0xff pattern:$0x75316420] }
  0x22   :  { %171 = vrot.lane.b32.xlu1 %v162_v21, %s1404_s25  ;;  %169 = vrot.lane.b32.xlu0 %v161_v22, %s1404_s25  ;;  %203 = vst [vmem:[#allocation1 + $0x10] ss:$2 sm:$0xff] %v1450_v0 }
  0x24   :  { %v1500_v23 = vld.sshfl [vmem:[#allocation1] sm:$0xff pattern:$0x75316420]  ;;  %v1502_v24 = vld.sshfl [vmem:[#allocation1 + $0x8] sm:$0xff pattern:$0x75316420] }
  0x25   :  { %201 = vst [vmem:[#allocation1] ss:$2 sm:$0xff] %v1455_v1 }
  0x27   :  { %v1505_v25 = vld.sshfl [vmem:[#allocation1 + $0x20] sm:$0xff pattern:$0x75316420]  ;;  %v1507_v26 = vld.sshfl [vmem:[#allocation1 + $0x28] sm:$0xff pattern:$0x75316420] }
  0x28   :  { %205 = vst [vmem:[#allocation1 + $0x20] ss:$2 sm:$0xff] %v1460_v2 }
  0x29   :  { %v209_v27 = vld.sshfl [vmem:[#allocation1 + $0x18] sm:$0xff pattern:$0x75316420]  ;;  %v208_v28 = vld.sshfl [vmem:[#allocation1 + $0x10] sm:$0xff pattern:$0x75316420] }
  0x2a   :  { %218 = vrot.lane.b32.xlu1 %v209_v27, %s1405_s26  ;;  %216 = vrot.lane.b32.xlu0 %v208_v28, %s1405_s26  ;;  %251 = vst [vmem:[#allocation1 + $0x11] ss:$2 sm:$0xff] %v1450_v0 }
  0x2c   :  { %v206_v29 = vld.sshfl [vmem:[#allocation1] sm:$0xff pattern:$0x75316420]  ;;  %v207_v30 = vld.sshfl [vmem:[#allocation1 + $0x8] sm:$0xff pattern:$0x75316420] }
  0x2d   :  { %212 = vrot.lane.b32.xlu2 %v206_v29, %s1405_s26  ;;  %249 = vst [vmem:[#allocation1 + $0x1] ss:$2 sm:$0xff] %v1455_v1 }
  0x2f   :  { %v210_v31 = vld.sshfl [vmem:[#allocation1 + $0x20] sm:$0xff pattern:$0x75316420]  ;;  %v1515_v32 = vld.sshfl [vmem:[#allocation1 + $0x28] sm:$0xff pattern:$0x75316420] }
  0x30   :  { %253 = vst [vmem:[#allocation1 + $0x21] ss:$2 sm:$0xff] %v1460_v2 }
  0x31   :  { %v256_v33 = vld.sshfl [vmem:[#allocation1 + $0x10] sm:$0xff pattern:$0x75316420]  ;;  %v257_v34 = vld.sshfl [vmem:[#allocation1 + $0x18] sm:$0xff pattern:$0x75316420] }
  0x32   :  { %220 = vrot.lane.b32.xlu1 %v210_v31, %s1405_s26  ;;  %214 = vrot.lane.b32.xlu0 %v207_v30, %s1405_s26  ;;  %298 = vst [vmem:[#allocation1 + $0x10] ss:$2 sm:$0xff] %v1450_v0 }
  0x34   :  { %v254_v35 = vld.sshfl [vmem:[#allocation1] sm:$0xff pattern:$0x75316420]  ;;  %v255_v36 = vld.sshfl [vmem:[#allocation1 + $0x8] sm:$0xff pattern:$0x75316420] }
  0x35   :  { %264 = vrot.lane.b32.xlu2 %v256_v33, %s1406_s27  ;;  %296 = vst [vmem:[#allocation1] ss:$2 sm:$0xff] %v1455_v1 }
  0x37   :  { %v258_v37 = vld.sshfl [vmem:[#allocation1 + $0x20] sm:$0xff pattern:$0x75316420]  ;;  %v1523_v38 = vld.sshfl [vmem:[#allocation1 + $0x28] sm:$0xff pattern:$0x75316420] }
  0x38   :  { %300 = vst [vmem:[#allocation1 + $0x20] ss:$2 sm:$0xff] %v1460_v2 }
  0x39   :  { %v303_v39 = vld.sshfl [vmem:[#allocation1 + $0x10] sm:$0xff pattern:$0x75316420]  ;;  %v304_v40 = vld.sshfl [vmem:[#allocation1 + $0x18] sm:$0xff pattern:$0x75316420] }
  0x3a   :  { %268 = vrot.lane.b32.xlu1 %v258_v37, %s1406_s27  ;;  %266 = vrot.lane.b32.xlu0 %v257_v34, %s1406_s27  ;;  %346 = vst [vmem:[#allocation1 + $0x11] ss:$2 sm:$0xff] %v1450_v0 }
  0x3c   :  { %v302_v41 = vld.sshfl [vmem:[#allocation1 + $0x8] sm:$0xff pattern:$0x75316420]  ;;  %v301_v42 = vld.sshfl [vmem:[#allocation1] sm:$0xff pattern:$0x75316420] }
  0x3d   :  { %260 = vrot.lane.b32.xlu2 %v254_v35, %s1406_s27  ;;  %344 = vst [vmem:[#allocation1 + $0x1] ss:$2 sm:$0xff] %v1455_v1 }
  0x3f   :  { %v305_v43 = vld.sshfl [vmem:[#allocation1 + $0x20] sm:$0xff pattern:$0x75316420]  ;;  %v306_v44 = vld.sshfl [vmem:[#allocation1 + $0x28] sm:$0xff pattern:$0x75316420] }
  0x40   :  { %348 = vst [vmem:[#allocation1 + $0x21] ss:$2 sm:$0xff] %v1460_v2 }
  0x41   :  { %v351_v45 = vld.sshfl [vmem:[#allocation1 + $0x10] sm:$0xff pattern:$0x75316420]  ;;  %v352_v46 = vld.sshfl [vmem:[#allocation1 + $0x18] sm:$0xff pattern:$0x75316420] }
  0x42   :  { %311 = vrot.lane.b32.xlu1 %v303_v39, %s1407_s28  ;;  %262 = vrot.lane.b32.xlu0 %v255_v36, %s1406_s27  ;;  %393 = vst [vmem:[#allocation1 + $0x10] ss:$2 sm:$0xff] %v1450_v0 }
  0x44   :  { %v350_v47 = vld.sshfl [vmem:[#allocation1 + $0x8] sm:$0xff pattern:$0x75316420]  ;;  %v349_v48 = vld.sshfl [vmem:[#allocation1] sm:$0xff pattern:$0x75316420] }
  0x45   :  { %309 = vrot.lane.b32.xlu2 %v302_v41, %s1407_s28  ;;  %391 = vst [vmem:[#allocation1] ss:$2 sm:$0xff] %v1455_v1 }
  0x47   :  { %v353_v49 = vld.sshfl [vmem:[#allocation1 + $0x20] sm:$0xff pattern:$0x75316420]  ;;  %v354_v50 = vld.sshfl [vmem:[#allocation1 + $0x28] sm:$0xff pattern:$0x75316420] }
  0x48   :  { %395 = vst [vmem:[#allocation1 + $0x20] ss:$2 sm:$0xff] %v1460_v2 }
  0x49   :  { %v398_v51 = vld.sshfl [vmem:[#allocation1 + $0x10] sm:$0xff pattern:$0x75316420]  ;;  %v399_v52 = vld.sshfl [vmem:[#allocation1 + $0x18] sm:$0xff pattern:$0x75316420] }
  0x4a   :  { %313 = vrot.lane.b32.xlu1 %v304_v40, %s1407_s28  ;;  %315 = vrot.lane.b32.xlu0 %v305_v43, %s1407_s28 }
  0x4c   :  { %v397_v53 = vld.sshfl [vmem:[#allocation1 + $0x8] sm:$0xff pattern:$0x75316420]  ;;  %v396_v55 = vld.sshfl [vmem:[#allocation1] sm:$0xff pattern:$0x75316420] }
  0x4d   :  { %359 = vrot.lane.b32.xlu2 %v351_v45, %s1408_s29 }
  0x4f   :  { %v400_v54 = vld.sshfl [vmem:[#allocation1 + $0x20] sm:$0xff pattern:$0x75316420]  ;;  %v401_v58 = vld.sshfl [vmem:[#allocation1 + $0x28] sm:$0xff pattern:$0x75316420] }
  0x52   :  { %363 = vrot.lane.b32.xlu0 %v353_v49, %s1408_s29  ;;  %307 = vrot.lane.b32.xlu1 %v301_v42, %s1407_s28 }
  0x55   :  { %361 = vrot.lane.b32.xlu2 %v352_v46, %s1408_s29 }
  0x5a   :  { %406 = vrot.lane.b32.xlu0 %v398_v51, %s1409_s30  ;;  %355 = vrot.lane.b32.xlu1 %v349_v48, %s1408_s29 }
  0x5d   :  { %357 = vrot.lane.b32.xlu2 %v350_v47, %s1408_s29 }
  0x62   :  { %408 = vrot.lane.b32.xlu0 %v399_v52, %s1409_s30  ;;  %404 = vrot.lane.b32.xlu1 %v397_v53, %s1409_s30 }
  0x65   :  { %410 = vrot.lane.b32.xlu2 %v400_v54, %s1409_s30 }
  0x6a   :  { %117 = vrot.lane.b32.xlu1 %v1487_v17, %s1403_s24  ;;  %402 = vrot.lane.b32.xlu0 %v396_v55, %s1409_s30 }
  0x6c   :  { %v1559_v56 = vpop.permute.xlu2 %73 }
  0x6d   :  { %119 = vrot.lane.b32.xlu2 %v1489_v18, %s1403_s24 }
  0x72   :  { %165 = vrot.lane.b32.xlu1 %v1500_v23, %s1404_s25  ;;  %75 = vrot.lane.b32.xlu0 %v1470_v10, %s1402_s0 }
  0x74   :  { %v1569_v57 = vpop.permute.xlu2 %123 }
  0x75   :  { %167 = vrot.lane.b32.xlu2 %v1502_v24, %s1404_s25 }
  0x7a   :  { %69 = vrot.lane.b32.xlu1 %v1474_v11, %s1402_s0  ;;  %125 = vrot.lane.b32.xlu0 %v1492_v19, %s1403_s24 }
  0x7d   :  { %71 = vrot.lane.b32.xlu2 %v1476_v12, %s1402_s0 }
  0x82   :  { %412 = vrot.lane.b32.xlu1 %v401_v58, %s1409_s30  ;;  %173 = vrot.lane.b32.xlu0 %v1505_v25, %s1404_s25 }
  0x85   :  { %317 = vrot.lane.b32.xlu2 %v306_v44, %s1407_s28 }
  0x87   :  { %v213_v59 = vpop.permute.xlu2 %212 }
  0x8a   :  { %222 = vrot.lane.b32.xlu1 %v1515_v32, %s1405_s26  ;;  %77 = vrot.lane.b32.xlu0 %v1479_v13, %s1402_s0 }
  0x8c   :  { %v1579_v60 = vpop.permute.xlu1 %121 }
  0x8d   :  { %270 = vrot.lane.b32.xlu2 %v1523_v38, %s1406_s27  ;;  %v132_v61 = vsel %vm129_vm0, %v1579_v60, %v1569_v57 }
  0x8e   :  { %143 = vst [vmem:[#allocation3 + $0x40] sm:$0xf] %v132_v61 }
  0x8f   :  { %v265_v62 = vpop.permute.xlu2 %264 }
  0x92   :  { %175 = vrot.lane.b32.xlu1 %v1507_v26, %s1404_s25  ;;  %365 = vrot.lane.b32.xlu0 %v354_v50, %s1408_s29 }
  0x94   :  { %v1589_v63 = vpop.permute.xlu1 %171  ;;  %v1591_v0 = vpop.permute.xlu0 %169 }
  0x95   :  { %v180_v1 = vsel %vm177_vm1, %v1591_v0, %v1589_v63  ;;  %79 = vrot.lane.b32.xlu2 %v1481_v14, %s1402_s0 }
  0x96   :  { %191 = vst [vmem:[#allocation3 + $0x40] sm:$0xf0] %v180_v1 }
  0x97   :  { %v261_v2 = vpop.permute.xlu2 %260 }
  0x9a   :  { %127 = vrot.lane.b32.xlu0 %v1494_v20, %s1403_s24 }
  0x9c   :  { %v219_v3 = vpop.permute.xlu1 %218  ;;  %v217_v4 = vpop.permute.xlu0 %216 }
  0x9d   :  { %v227_v5 = vsel %vm224_vm2, %v217_v4, %v219_v3 }
  0x9e   :  { %238 = vst [vmem:[#allocation3 + $0x70] sm:$0xf] %v227_v5 }
  0x9f   :  { %v310_v6 = vpop.permute.xlu2 %309 }
  0xa4   :  { %v1601_v7 = vpop.permute.xlu1 %220  ;;  %v215_v9 = vpop.permute.xlu0 %214 }
  0xa5   :  { %v228_v10 = vsel %vm224_vm2, %v219_v3, %v1601_v7  ;;  %v225_v11 = vsel %vm224_vm2, %v213_v59, %v215_v9  ;;  %v226_v12 = vsel %vm224_vm2, %v215_v9, %v217_v4  ;;  %v441_v3 = vld [vmem:[#allocation3 + $0x40] sm:$0xff] }
  0xa6   :  { %239 = vst [vmem:[#allocation3 + $0x78] sm:$0xf] %v228_v10 }
  0xa7   :  { %236 = vst [vmem:[#allocation3 + $0x60] sm:$0xf] %v225_v11  ;;  %v360_v13 = vpop.permute.xlu2 %359 }
  0xa8   :  { %237 = vst [vmem:[#allocation3 + $0x68] sm:$0xf] %v226_v12 }
  0xac   :  { %v1607_v14 = vpop.permute.xlu1 %268  ;;  %v267_v15 = vpop.permute.xlu0 %266 }
  0xad   :  { %v275_v16 = vsel %vm272_vm3, %v265_v62, %v267_v15  ;;  %v276_v17 = vsel %vm272_vm3, %v267_v15, %v1607_v14 }
  0xae   :  { %286 = vst [vmem:[#allocation3 + $0x70] sm:$0xf0] %v275_v16 }
  0xaf   :  { %287 = vst [vmem:[#allocation3 + $0x78] sm:$0xf0] %v276_v17  ;;  %v362_v18 = vpop.permute.xlu2 %361  ;;  %v1659_v17 = vld [vmem:[%s1996_s1] sm:$0xff] }
  0xb0   :  { %v370_v19 = vsel %vm367_vm4, %v360_v13, %v362_v18 }
  0xb1   :  { %381 = vst [vmem:[#allocation3 + $0xa0] sm:$0xf0] %v370_v19 }
  0xb4   :  { %v312_v20 = vpop.permute.xlu1 %311  ;;  %v263_v21 = vpop.permute.xlu0 %262 }
  0xb5   :  { %v321_v22 = vsel %vm319_vm5, %v310_v6, %v312_v20  ;;  %v273_v23 = vsel %vm272_vm3, %v261_v2, %v263_v21  ;;  %v274_v24 = vsel %vm272_vm3, %v263_v21, %v265_v62 }
  0xb6   :  { %332 = vst [vmem:[#allocation3 + $0x98] sm:$0xf] %v321_v22  ;;  %v448_v1 = vld [vmem:[#allocation3 + $0x78] sm:$0xff] }
  0xb7   :  { %284 = vst [vmem:[#allocation3 + $0x60] sm:$0xf0] %v273_v23  ;;  %v358_v25 = vpop.permute.xlu2 %357 }
  0xb8   :  { %285 = vst [vmem:[#allocation3 + $0x68] sm:$0xf0] %v274_v24  ;;  %v369_v26 = vsel %vm367_vm4, %v358_v25, %v360_v13 }
  0xb9   :  { %380 = vst [vmem:[#allocation3 + $0x98] sm:$0xf0] %v369_v26 }
  0xbc   :  { %v314_v27 = vpop.permute.xlu1 %313  ;;  %v316_v28 = vpop.permute.xlu0 %315 }
  0xbd   :  { %v322_v29 = vsel %vm319_vm5, %v312_v20, %v314_v27  ;;  %v323_v30 = vsel %vm319_vm5, %v314_v27, %v316_v28 }
  0xbe   :  { %333 = vst [vmem:[#allocation3 + $0xa0] sm:$0xf] %v322_v29 }
  0xbf   :  { %334 = vst [vmem:[#allocation3 + $0xa8] sm:$0xf] %v323_v30  ;;  %v1621_v31 = vpop.permute.xlu2 %410  ;;  %v446_v2 = vld [vmem:[#allocation3 + $0x68] sm:$0xff] }
  0xc0   :  { %v452_v62 = vld [vmem:[#allocation3 + $0x98] sm:$0xff] }
  0xc4   :  { %v1623_v32 = vpop.permute.xlu0 %363  ;;  %v308_v33 = vpop.permute.xlu1 %307 }
  0xc5   :  { %v371_v34 = vsel %vm367_vm4, %v362_v18, %v1623_v32  ;;  %v320_v35 = vsel %vm319_vm5, %v308_v33, %v310_v6  ;;  %v453_v59 = vld [vmem:[#allocation3 + $0xa0] sm:$0xff] }
  0xc6   :  { %382 = vst [vmem:[#allocation3 + $0xa8] sm:$0xf0] %v371_v34 }
  0xc7   :  { %331 = vst [vmem:[#allocation3 + $0x90] sm:$0xf] %v320_v35  ;;  %v120_v8 = vpop.permute.xlu2 %119 }
  0xc8   :  { %v131_v36 = vsel %vm129_vm0, %v120_v8, %v1579_v60 }
  0xc9   :  { %142 = vst [vmem:[#allocation3 + $0x38] sm:$0xf] %v131_v36 }
  0xcc   :  { %v407_v37 = vpop.permute.xlu0 %406  ;;  %v356_v38 = vpop.permute.xlu1 %355 }
  0xcd   :  { %v368_v39 = vsel %vm367_vm4, %v356_v38, %v358_v25  ;;  %v454_v61 = vld [vmem:[#allocation3 + $0xa8] sm:$0xff] }
  0xce   :  { %379 = vst [vmem:[#allocation3 + $0x90] sm:$0xf0] %v368_v39 }
  0xcf   :  { %v168_v40 = vpop.permute.xlu2 %167 }
  0xd0   :  { %v179_v41 = vsel %vm177_vm1, %v168_v40, %v1591_v0  ;;  %v447_v0 = vld [vmem:[#allocation3 + $0x70] sm:$0xff] }
  0xd1   :  { %190 = vst [vmem:[#allocation3 + $0x38] sm:$0xf0] %v179_v41 }
  0xd4   :  { %v409_v42 = vpop.permute.xlu0 %408  ;;  %v405_v43 = vpop.permute.xlu1 %404 }
  0xd5   :  { %v417_v44 = vsel %vm414_vm7, %v407_v37, %v409_v42  ;;  %v418_v45 = vsel %vm414_vm7, %v409_v42, %v1621_v31  ;;  %v416_v46 = vsel %vm414_vm7, %v405_v43, %v407_v37  ;;  %v451_v16 = vld [vmem:[#allocation3 + $0x90] sm:$0xff] }
  0xd6   :  { %428 = vst [vmem:[#allocation3 + $0xd0] sm:$0xf] %v417_v44 }
  0xd7   :  { %429 = vst [vmem:[#allocation3 + $0xd8] sm:$0xf] %v418_v45  ;;  %v1637_v47 = vpop.permute.xlu2 %71 }
  0xd8   :  { %v83_v48 = vsel %vm81_vm8, %v1637_v47, %v1559_v56  ;;  %427 = vst [vmem:[#allocation3 + $0xc8] sm:$0xf] %v416_v46  ;;  %v440_v6 = vld [vmem:[#allocation3 + $0x38] sm:$0xff] }
  0xd9   :  { %94 = vst [vmem:[#allocation3 + $0x8] sm:$0xf0] %v83_v48  ;;  %v20_v48 = vld [vmem:[%s1997_s4] sm:$0x3f] }
  0xdc   :  { %v118_v49 = vpop.permute.xlu1 %117  ;;  %v403_v50 = vpop.permute.xlu0 %402 }
  0xdd   :  { %v130_v51 = vsel %vm129_vm0, %v118_v49, %v120_v8  ;;  %v415_v52 = vsel %vm414_vm7, %v403_v50, %v405_v43  ;;  %v459_v53 = vld [vmem:[#allocation3 + $0xd0] sm:$0xf]  ;;  %v1700_v49 = vperm.slane %v20_v48, 0  ;;  %v1702_v50 = vperm.slane %v20_v48, 1 }
  0xde   :  { %141 = vst [vmem:[#allocation3 + $0x30] sm:$0xf] %v130_v51  ;;  %1364 = vmatpush.msk.msra.mxu2 %vm467_vm9, %v459_v53  ;;  %v460_v54 = vld [vmem:[#allocation3 + $0xd8] sm:$0xf] }
  0xdf   :  { %v318_v55 = vpop.permute.xlu2 %317  ;;  %426 = vst [vmem:[#allocation3 + $0xc0] sm:$0xf] %v415_v52  ;;  %v458_v58 = vld [vmem:[#allocation3 + $0xc8] sm:$0xf]  ;;  %1366 = vmatpush.msk.msra.mxu3 %vm467_vm9, %v460_v54 }
  0xe0   :  { %v324_v60 = vsel %vm319_vm5, %v316_v28, %v318_v55  ;;  %336 = vst.msk [vmem:[#allocation3 + $0xb8] sm:$0xf] %vm49_vm6, %v318_v55  ;;  %1362 = vmatpush.msk.msra.mxu1 %vm467_vm9, %v458_v58  ;;  %538 = vmatpush.msra.mxu2 %v453_v59  ;;  %v434_v13 = vld [vmem:[#allocation3 + $0x8] sm:$0xff]  ;;  %v1712_v55 = vperm.slane %v20_v48, 2 }
  0xe1   :  { %335 = vst [vmem:[#allocation3 + $0xb0] sm:$0xf] %v324_v60  ;;  %558 = vmatpush.msra.mxu3 %v454_v61 }
  0xe2   :  { %518 = vmatpush.msra.mxu1 %v452_v62  ;;  %539 = vmatpush.msra.mxu2 %v447_v0  ;;  %v1720_v62 = vperm.slane %v20_v48, 3 }
  0xe3   :  { %559 = vmatpush.msra.mxu3 %v448_v1 }
  0xe4   :  { %519 = vmatpush.msra.mxu1 %v446_v2  ;;  %540 = vmatpush.msra.mxu2 %v441_v3  ;;  %v166_v4 = vpop.permute.xlu1 %165  ;;  %v76_v5 = vpop.permute.xlu0 %75 }
  0xe5   :  { %v178_v9 = vsel %vm177_vm1, %v166_v4, %v168_v40  ;;  %v84_v10 = vsel %vm81_vm8, %v1559_v56, %v76_v5  ;;  %v445_v56 = vld [vmem:[#allocation3 + $0x60] sm:$0xff] }
  0xe6   :  { %520 = vmatpush.msra.mxu1 %v440_v6  ;;  %189 = vst [vmem:[#allocation3 + $0x30] sm:$0xf0] %v178_v9  ;;  %v457_v11 = vld [vmem:[#allocation3 + $0xc0] sm:$0xf]  ;;  %v1726_v9 = vperm.slane %v20_v48, 4 }
  0xe7   :  { %v271_v12 = vpop.permute.xlu2 %270  ;;  %95 = vst [vmem:[#allocation3 + $0x10] sm:$0xf0] %v84_v10  ;;  %1360 = vmatpush.msk.msra.mxu0 %vm467_vm9, %v457_v11 }
  0xe8   :  { %v277_v15 = vsel %vm272_vm3, %v1607_v14, %v271_v12  ;;  %289 = vst.msk [vmem:[#allocation3 + $0x88] sm:$0xf0] %vm98_vm10, %v271_v12  ;;  %521 = vmatpush.msra.mxu1 %v434_v13 }
  0xe9   :  { %288 = vst [vmem:[#allocation3 + $0x80] sm:$0xf0] %v277_v15  ;;  %498 = vmatpush.msra.mxu0 %v451_v16  ;;  %1363 = vmatmul.msk.f32.vlgmr.msra.gmra.mxu1 %vm463_vm11, %v1659_v17 }
  0xeb   :  { %499 = vmatpush.msra.mxu0 %v445_v56 }
  0xec   :  { %v70_v18 = vpop.permute.xlu1 %69  ;;  %v126_v19 = vpop.permute.xlu0 %125 }
  0xed   :  { %v82_v14 = vsel %vm81_vm8, %v70_v18, %v1637_v47  ;;  %v133_v20 = vsel %vm129_vm0, %v1569_v57, %v126_v19  ;;  %v439_v21 = vld [vmem:[#allocation3 + $0x30] sm:$0xff] }
  0xee   :  { %93 = vst [vmem:[#allocation3] sm:$0xf0] %v82_v14  ;;  %500 = vmatpush.msra.mxu0 %v439_v21  ;;  %v435_v22 = vld [vmem:[#allocation3 + $0x10] sm:$0xff] }
  0xef   :  { %144 = vst [vmem:[#allocation3 + $0x48] sm:$0xf] %v133_v20  ;;  %541 = vmatpush.msra.mxu2 %v435_v22  ;;  %v80_v23 = vpop.permute.xlu2 %79 }
  0xf0   :  { %99 = vst.msk [vmem:[#allocation3 + $0x28] sm:$0xf0] %vm98_vm10, %v80_v23  ;;  %1365 = vmatmul.msk.f32.vlgmr.msra.gmra.mxu2 %vm463_vm11, %v1659_v17 }
  0xf4   :  { %v413_v24 = vpop.permute.xlu1 %412  ;;  %v174_v25 = vpop.permute.xlu0 %173 }
  0xf5   :  { %v419_v26 = vsel %vm414_vm7, %v1621_v31, %v413_v24  ;;  %431 = vst.msk [vmem:[#allocation3 + $0xe8] sm:$0xf] %vm49_vm6, %v413_v24  ;;  %v181_v57 = vsel %vm177_vm1, %v1589_v63, %v174_v25  ;;  %v433_v27 = vld [vmem:[#allocation3] sm:$0xff] }
  0xf6   :  { %430 = vst [vmem:[#allocation3 + $0xe0] sm:$0xf] %v419_v26  ;;  %501 = vmatpush.msra.mxu0 %v433_v27 }
  0xf7   :  { %192 = vst [vmem:[#allocation3 + $0x48] sm:$0xf0] %v181_v57  ;;  %1361 = vmatmul.msk.f32.vlgmr.msra.gmra.mxu0 %vm463_vm11, %v1659_v17  ;;  %v438_v45 = vld [vmem:[#allocation3 + $0x28] sm:$0xff] }
  0xfc   :  { %v223_v28 = vpop.permute.xlu1 %222  ;;  %v78_v29 = vpop.permute.xlu0 %77  ;;  %v462_v30 = vld [vmem:[#allocation3 + $0xe8] sm:$0xf] }
  0xfd   :  { %v229_v33 = vsel %vm224_vm2, %v1601_v7, %v223_v28  ;;  %241 = vst.msk [vmem:[#allocation3 + $0x88] sm:$0xf] %vm49_vm6, %v223_v28  ;;  %v85_v31 = vsel %vm81_vm8, %v76_v5, %v78_v29  ;;  %v86_v34 = vsel %vm81_vm8, %v78_v29, %v80_v23  ;;  %v461_v63 = vld [vmem:[#allocation3 + $0xe0] sm:$0xf]  ;;  %1370 = vmatpush.msk.msrb.mxu1 %vm467_vm9, %v462_v30  ;;  %v1724_v5 = vperm.slane %v20_v48, 5 }
  0xfe   :  { %240 = vst [vmem:[#allocation3 + $0x80] sm:$0xf] %v229_v33  ;;  %v442_v35 = vld [vmem:[#allocation3 + $0x48] sm:$0xff]  ;;  %1368 = vmatpush.msk.msrb.mxu0 %vm467_vm9, %v461_v63  ;;  %vm743_vm9 = vcmask 1047704  }
  0xff   :  { %96 = vst [vmem:[#allocation3 + $0x18] sm:$0xf0] %v85_v31  ;;  %560 = vmatpush.msra.mxu3 %v442_v35 }
 0x100   :  { %97 = vst [vmem:[#allocation3 + $0x20] sm:$0xf0] %v86_v34 }
 0x104   :  { %v176_v8 = vpop.permute.xlu1 %175  ;;  %v366_v36 = vpop.permute.xlu0 %365  ;;  %v450_v43 = vld [vmem:[#allocation3 + $0x88] sm:$0xff] }
 0x105   :  { %v182_v7 = vsel %vm177_vm1, %v174_v25, %v176_v8  ;;  %194 = vst.msk [vmem:[#allocation3 + $0x58] sm:$0xf0] %vm98_vm10, %v176_v8  ;;  %v372_v37 = vsel %vm367_vm4, %v1623_v32, %v366_v36  ;;  %v449_v32 = vld [vmem:[#allocation3 + $0x80] sm:$0xff]  ;;  %v1410_v25 = vmov 0  }
 0x106   :  { %193 = vst [vmem:[#allocation3 + $0x50] sm:$0xf0] %v182_v7  ;;  %v436_v38 = vld [vmem:[#allocation3 + $0x18] sm:$0xff]  ;;  %1393 = vset.pattern.permute.xlu2 %v1410_v25  ;;  %v1739_v7 = vld [vmem:[%s1998_s3] sm:$0xff]  ;;  %s1414_s3 = smov 19  }
 0x107   :  { %383 = vst [vmem:[#allocation3 + $0xb0] sm:$0xf0] %v372_v37  ;;  %561 = vmatpush.msra.mxu3 %v436_v38  ;;  %v437_v47 = vld [vmem:[#allocation3 + $0x20] sm:$0xff] }
 0x108   :  { %384 = vst.msk [vmem:[#allocation3 + $0xb8] sm:$0xf0] %vm98_vm10, %v366_v36  ;;  %1367 = vmatmul.msk.f32.vlgmr.msra.gmra.mxu3 %vm463_vm11, %v1659_v17  ;;  %vm731_vm10 = vcmask 154624  }
 0x10c   :  { %v128_v39 = vpop.permute.xlu0 %127 }
 0x10d   :  { %v134_v40 = vsel %vm129_vm0, %v126_v19, %v128_v39  ;;  %146 = vst.msk [vmem:[#allocation3 + $0x58] sm:$0xf] %vm49_vm6, %v128_v39  ;;  %vm705_vm6 = vcmask 375808  }
 0x10e   :  { %145 = vst [vmem:[#allocation3 + $0x50] sm:$0xf] %v134_v40  ;;  %v455_v41 = vld [vmem:[#allocation3 + $0xb0] sm:$0xff] }
 0x10f   :  { %v456_v42 = vld [vmem:[#allocation3 + $0xb8] sm:$0xff]  ;;  %578 = vmatpush.msrb.mxu0 %v455_v41  ;;  %v1412_v41 = vmov 1  }
 0x110   :  { %598 = vmatpush.msrb.mxu1 %v456_v42 }
 0x111   :  { %579 = vmatpush.msrb.mxu0 %v449_v32 }
 0x112   :  { %599 = vmatpush.msrb.mxu1 %v450_v43 }
 0x114   :  { %v444_v44 = vld [vmem:[#allocation3 + $0x58] sm:$0xff] }
 0x115   :  { %600 = vmatpush.msrb.mxu1 %v444_v44  ;;  %v443_v46 = vld [vmem:[#allocation3 + $0x50] sm:$0xff] }
 0x116   :  { %580 = vmatpush.msrb.mxu0 %v443_v46 }
 0x117   :  { %601 = vmatpush.msrb.mxu1 %v438_v45 }
 0x118   :  { %581 = vmatpush.msrb.mxu0 %v437_v47  ;;  %1371 = vmatmul.msk.f32.vlgmr.msrb.gmra.mxu1 %vm463_vm11, %v1659_v17 }
 0x119   :  { %1369 = vmatmul.msk.f32.vlgmr.msrb.gmra.mxu0 %vm463_vm11, %v1659_v17  ;;  %vm749_vm11 = vcmask 220160  }
 0x166   :  { %v1706_v52 = vpop.f32.mrf.mxu1 }
 0x167   :  { %v621_v54 = vmul.f32 %v1702_v50, %v1706_v52 }
 0x169   :  { %v636_v60 = vmul.f32 %v621_v54, %v1706_v52 }
 0x173   :  { %v1714_v58 = vpop.f32.mrf.mxu2 }
 0x174   :  { %v1704_v51 = vpop.f32.mrf.mxu0  ;;  %v622_v61 = vmul.f32 %v1712_v55, %v1714_v58 }
 0x175   :  { %v620_v53 = vmul.f32 %v1700_v49, %v1704_v51 }
 0x176   :  { %v637_v3 = vmul.f32 %v622_v61, %v1714_v58 }
 0x177   :  { %v635_v59 = vmul.f32 %v620_v53, %v1704_v51  ;;  %v626_v1 = vadd.f32 %v621_v54, %v620_v53 }
 0x179   :  { %v641_v2 = vadd.f32 %v636_v60, %v635_v59  ;;  %v627_v6 = vadd.f32 %v626_v1, %v622_v61  ;;  %v1413_v59 = vmov 0.0  }
 0x17a   :  { %700 = vst [vmem:[#allocation2] sm:$0xff] %v1413_v59 }
 0x17b   :  { %v642_v10 = vadd.f32 %v641_v2, %v637_v3  ;;  %706 = vst.msk [vmem:[#allocation2 + $0x28] sm:$0xff] %vm705_vm6, %v1413_v59 }
 0x18b   :  { %v563_v0 = vpop.f32.mrf.mxu3 }
 0x18c   :  { %v623_v4 = vmul.f32 %v1720_v62, %v563_v0 }
 0x18e   :  { %v638_v11 = vmul.f32 %v623_v4, %v563_v0  ;;  %v628_v17 = vadd.f32 %v627_v6, %v623_v4 }
 0x190   :  { %v643_v20 = vadd.f32 %v642_v10, %v638_v11 }
 0x195   :  { %v1728_v12 = vpop.f32.mrf.mxu1 }
 0x196   :  { %v625_v13 = vmul.f32 %v1724_v5, %v1728_v12  ;;  %v583_v15 = vpop.f32.mrf.mxu0 }
 0x197   :  { %v624_v16 = vmul.f32 %v1726_v9, %v583_v15 }
 0x198   :  { %v640_v56 = vmul.f32 %v625_v13, %v1728_v12  ;;  %v631_v18 = vsel %vm630_vm12, %v625_v13, 0.0 }
 0x199   :  { %v639_v19 = vmul.f32 %v624_v16, %v583_v15  ;;  %v629_v14 = vadd.f32 %v628_v17, %v624_v16 }
 0x19a   :  { %v645_v23 = vsel %vm630_vm12, %v640_v56, 0.0 }
 0x19b   :  { %v632_v21 = vadd.f32 %v631_v18, %v629_v14  ;;  %v644_v22 = vadd.f32 %v643_v20, %v639_v19 }
 0x19d   :  { %633 = vadd.xlane.f32.xlu0 %v632_v21  ;;  %v646_v24 = vadd.f32 %v645_v23, %v644_v22 }
 0x19f   :  { %647 = vadd.xlane.f32.xlu1 %v646_v24 }
 0x210   :  { %v634_v26 = vpop.xlane.xlu0 %633 }
 0x211   :  { %v649_v57 = vmul.f32 0.001953125, %v634_v26 }
 0x212   :  { %v648_v27 = vpop.xlane.xlu1 %647 }
 0x213   :  { %v651_v28 = vmul.f32 %v649_v57, %v649_v57  ;;  %v650_v29 = vmul.f32 0.001953125, %v648_v27 }
 0x215   :  { %v652_v30 = vsub.f32 %v650_v29, %v651_v28 }
 0x217   :  { %v653_v33 = vmax.f32 %v652_v30, 0.0 }
 0x219   :  { %v654_v31 = vadd.f32 1e-05, %v653_v33 }
 0x21b   :  { %1398 = vrsqrt.f32 %v654_v31  ;;  %vm661_vm14 = vweird.f32 %v654_v31 }
 0x221   :  { %v1399_v34 = vpop.eup %1398 }
 0x222   :  { %v656_v63 = vmul.f32 %v1399_v34, %v654_v31  ;;  %vm662_vm13 = vweird.f32 %v1399_v34 }
 0x223   :  { %vm663_vm15 = vmor %vm661_vm14, %vm662_vm13 }
 0x224   :  { %v657_v35 = vmul.f32 %v1399_v34, %v656_v63 }
 0x226   :  { %v658_v8 = vmul.f32 0.5, %v657_v35 }
 0x228   :  { %v659_v36 = vsub.f32 1.5, %v658_v8 }
 0x22a   :  { %v660_v37 = vmul.f32 %v1399_v34, %v659_v36 }
 0x22c   :  { %v664_v38 = vsel %vm663_vm15, %v1399_v34, %v660_v37 }
 0x22d   :  { %v665_v39 = vmul.f32 %v664_v38, %v1739_v7 }
 0x22f   :  { %674 = vperm.xlu2 %1393, %v665_v39   ;;  %v666_v40 = vmul.f32 %v665_v39, %v649_v57 }
 0x237   :  { %668 = vrot.lane.b32.xlu2 %v666_v40, %s1411_s10 }
 0x238   :  { %1394 = vset.pattern.permute.xlu2 %v1412_v41 }
 0x289   :  { %v675_v42 = vpop.permute.xlu2 %674 }
 0x28a   :  { %v681_v44 = vmul.f32 %v675_v42, %v583_v15  ;;  %v680_v45 = vmul.f32 %v675_v42, %v563_v0  ;;  %v677_v46 = vmul.f32 %v675_v42, %v1704_v51  ;;  %v678_v2 = vmul.f32 %v675_v42, %v1706_v52 }
 0x28b   :  { %v679_v10 = vmul.f32 %v675_v42, %v1714_v58  ;;  %v682_v52 = vmul.f32 %v675_v42, %v1728_v12 }
 0x291   :  { %v669_v32 = vpop.permute.xlu2 %668 }
 0x292   :  { %v671_v43 = vsub.f32 %v1739_v7, %v669_v32 }
 0x294   :  { %685 = vperm.xlu2 %1394, %v671_v43  }
 0x2ee   :  { %v686_v47 = vpop.permute.xlu2 %685 }
 0x2ef   :  { %v692_v48 = vadd.f32 %v686_v47, %v681_v44  ;;  %v691_v53 = vadd.f32 %v686_v47, %v680_v45  ;;  %v688_v54 = vadd.f32 %v686_v47, %v677_v46  ;;  %v689_v0 = vadd.f32 %v686_v47, %v678_v2 }
 0x2f0   :  { %v690_v13 = vadd.f32 %v686_v47, %v679_v10  ;;  %v693_v17 = vadd.f32 %v686_v47, %v682_v52 }
 0x2f1   :  { %v698_v60 = vmax.f32 %v692_v48, 0.0  ;;  %v697_v61 = vmax.f32 %v691_v53, 0.0  ;;  %v694_v1 = vmax.f32 %v688_v54, 0.0  ;;  %v695_v51 = vmax.f32 %v689_v0, 0.0 }
 0x2f2   :  { %v696_v15 = vmax.f32 %v690_v13, 0.0  ;;  %v699_v56 = vmax.f32 %v693_v17, 0.0 }
 0x2f3   :  { %v711_v3 = vmul.f32 %v698_v60, %v1726_v9  ;;  %v710_v4 = vmul.f32 %v697_v61, %v1720_v62  ;;  %v707_v6 = vmul.f32 %v694_v1, %v1700_v49  ;;  %v708_v11 = vmul.f32 %v695_v51, %v1702_v50 }
 0x2f4   :  { %v709_v16 = vmul.f32 %v696_v15, %v1712_v55  ;;  %v712_v18 = vmul.f32 %v699_v56, %v1724_v5 }
 0x2f5   :  { %727 = vrot.lane.b32.xlu1 %v711_v3, %s1414_s3  ;;  %725 = vrot.lane.b32.xlu0 %v710_v4, %s1414_s3 }
 0x2f6   :  { %719 = vrot.lane.b32.xlu2 %v707_v6, %s1414_s3 }
 0x2fe   :  { %721 = vrot.lane.b32.xlu2 %v708_v11, %s1414_s3 }
 0x306   :  { %723 = vrot.lane.b32.xlu2 %v709_v16, %s1414_s3 }
 0x30e   :  { %729 = vrot.lane.b32.xlu2 %v712_v18, %s1414_s3 }
 0x350   :  { %v720_v19 = vpop.permute.xlu2 %719 }
 0x351   :  { %744 = vst.msk [vmem:[#allocation2] sm:$0xff] %vm743_vm9, %v720_v19 }
 0x358   :  { %v722_v58 = vpop.permute.xlu2 %721  ;;  %v1754_v14 = vld [vmem:[#allocation2] sm:$0xff] }
 0x359   :  { %v1757_v20 = vsel %vm731_vm10, %v720_v19, %v722_v58  ;;  %1062 = vrot.lane.b32.xlu2 %v1754_v14, %s1409_s30  ;;  %1021 = vrot.lane.b32.xlu1 %v1754_v14, %s1408_s29 }
 0x35a   :  { %1064 = vrot.lane.b32.xlu0 %v1757_v20, %s1409_s30 }
 0x360   :  { %v724_v12 = vpop.permute.xlu2 %723 }
 0x361   :  { %v1766_v21 = vsel %vm731_vm10, %v722_v58, %v724_v12  ;;  %980 = vrot.lane.b32.xlu1 %v1754_v14, %s1407_s28  ;;  %857 = vrot.lane.b32.xlu2 %v1754_v14, %s1404_s25 }
 0x362   :  { %1023 = vrot.lane.b32.xlu0 %v1757_v20, %s1408_s29 }
 0x367   :  { %v728_v22 = vpop.permute.xlu1 %727  ;;  %v726_v23 = vpop.permute.xlu0 %725 }
 0x368   :  { %v1775_v24 = vsel %vm731_vm10, %v724_v12, %v726_v23  ;;  %v1778_v25 = vsel %vm731_vm10, %v726_v23, %v728_v22  ;;  %v730_v26 = vpop.permute.xlu2 %729 }
 0x369   :  { %v736_v57 = vsel %vm731_vm10, %v728_v22, %v730_v26  ;;  %939 = vrot.lane.b32.xlu1 %v1754_v14, %s1406_s27  ;;  %816 = vrot.lane.b32.xlu2 %v1754_v14, %s1403_s24 }
 0x36a   :  { %982 = vrot.lane.b32.xlu0 %v1757_v20, %s1407_s28  ;;  %750 = vst.msk [vmem:[#allocation2 + $0x28] sm:$0xff] %vm749_vm11, %v736_v57 }
 0x371   :  { %898 = vrot.lane.b32.xlu1 %v1754_v14, %s1405_s26  ;;  %775 = vrot.lane.b32.xlu2 %v1754_v14, %s1402_s0  ;;  %v1055_v27 = vld [vmem:[#allocation2 + $0x28] sm:$0xff] }
 0x372   :  { %941 = vrot.lane.b32.xlu0 %v1757_v20, %s1406_s27  ;;  %762 = vst.msk [vmem:[#allocation4 + $0x28] sm:$0xff] %vm630_vm12, %v1055_v27 }
 0x379   :  { %1066 = vrot.lane.b32.xlu2 %v1766_v21, %s1409_s30  ;;  %1072 = vrot.lane.b32.xlu1 %v1055_v27, %s1409_s30 }
 0x37a   :  { %900 = vrot.lane.b32.xlu0 %v1757_v20, %s1405_s26 }
 0x381   :  { %1025 = vrot.lane.b32.xlu2 %v1766_v21, %s1408_s29  ;;  %859 = vrot.lane.b32.xlu1 %v1757_v20, %s1404_s25 }
 0x382   :  { %902 = vrot.lane.b32.xlu0 %v1766_v21, %s1405_s26 }
 0x389   :  { %984 = vrot.lane.b32.xlu2 %v1766_v21, %s1407_s28  ;;  %1068 = vrot.lane.b32.xlu1 %v1775_v24, %s1409_s30 }
 0x38a   :  { %1029 = vrot.lane.b32.xlu0 %v1778_v25, %s1408_s29 }
 0x391   :  { %943 = vrot.lane.b32.xlu2 %v1766_v21, %s1406_s27  ;;  %818 = vrot.lane.b32.xlu1 %v1757_v20, %s1403_s24 }
 0x392   :  { %861 = vrot.lane.b32.xlu0 %v1766_v21, %s1404_s25 }
 0x399   :  { %1070 = vrot.lane.b32.xlu2 %v1778_v25, %s1409_s30  ;;  %1027 = vrot.lane.b32.xlu1 %v1775_v24, %s1408_s29 }
 0x39a   :  { %988 = vrot.lane.b32.xlu0 %v1778_v25, %s1407_s28 }
 0x3a1   :  { %777 = vrot.lane.b32.xlu1 %v1757_v20, %s1402_s0  ;;  %1031 = vrot.lane.b32.xlu2 %v1055_v27, %s1408_s29 }
 0x3a2   :  { %820 = vrot.lane.b32.xlu0 %v1766_v21, %s1403_s24 }
 0x3a9   :  { %986 = vrot.lane.b32.xlu1 %v1775_v24, %s1407_s28  ;;  %990 = vrot.lane.b32.xlu2 %v1055_v27, %s1407_s28 }
 0x3aa   :  { %947 = vrot.lane.b32.xlu0 %v1778_v25, %s1406_s27 }
 0x3b1   :  { %949 = vrot.lane.b32.xlu2 %v1055_v27, %s1406_s27  ;;  %908 = vrot.lane.b32.xlu1 %v1055_v27, %s1405_s26 }
 0x3b2   :  { %779 = vrot.lane.b32.xlu0 %v1766_v21, %s1402_s0 }
 0x3b3   :  { %v1063_v28 = vpop.permute.xlu2 %1062 }
 0x3b9   :  { %906 = vrot.lane.b32.xlu2 %v1778_v25, %s1405_s26  ;;  %867 = vrot.lane.b32.xlu1 %v1055_v27, %s1404_s25 }
 0x3ba   :  { %945 = vrot.lane.b32.xlu0 %v1775_v24, %s1406_s27 }
 0x3bb   :  { %v858_v29 = vpop.permute.xlu2 %857 }
 0x3c1   :  { %865 = vrot.lane.b32.xlu2 %v1778_v25, %s1404_s25  ;;  %826 = vrot.lane.b32.xlu1 %v1055_v27, %s1403_s24 }
 0x3c2   :  { %904 = vrot.lane.b32.xlu0 %v1775_v24, %s1405_s26 }
 0x3c3   :  { %v817_v30 = vpop.permute.xlu2 %816 }
 0x3c9   :  { %824 = vrot.lane.b32.xlu2 %v1778_v25, %s1403_s24  ;;  %785 = vrot.lane.b32.xlu1 %v1055_v27, %s1402_s0 }
 0x3ca   :  { %863 = vrot.lane.b32.xlu0 %v1775_v24, %s1404_s25 }
 0x3cb   :  { %v1022_v33 = vpop.permute.xlu1 %1021  ;;  %v1852_v31 = vpop.permute.xlu2 %775 }
 0x3cc   :  { %v1065_v34 = vpop.permute.xlu0 %1064 }
 0x3cd   :  { %v1074_v63 = vsel %vm414_vm7, %v1063_v28, %v1065_v34 }
 0x3ce   :  { %1157 = vmatpush.msrb.mxu2 %v1074_v63 }
 0x3d1   :  { %783 = vrot.lane.b32.xlu2 %v1778_v25, %s1402_s0 }
 0x3d2   :  { %822 = vrot.lane.b32.xlu0 %v1775_v24, %s1403_s24 }
 0x3d3   :  { %v981_v35 = vpop.permute.xlu1 %980  ;;  %v1067_v8 = vpop.permute.xlu2 %1066 }
 0x3d4   :  { %v1075_v36 = vsel %vm414_vm7, %v1065_v34, %v1067_v8  ;;  %v1024_v37 = vpop.permute.xlu0 %1023 }
 0x3d5   :  { %v1033_v38 = vsel %vm367_vm4, %v1022_v33, %v1024_v37  ;;  %1177 = vmatpush.msrb.mxu3 %v1075_v36 }
 0x3d6   :  { %1158 = vmatpush.msrb.mxu2 %v1033_v38 }
 0x3d9   :  { %781 = vrot.lane.b32.xlu2 %v1775_v24, %s1402_s0 }
 0x3db   :  { %v940_v39 = vpop.permute.xlu1 %939  ;;  %v1026_v40 = vpop.permute.xlu2 %1025 }
 0x3dc   :  { %v1034_v41 = vsel %vm367_vm4, %v1024_v37, %v1026_v40  ;;  %v983_v42 = vpop.permute.xlu0 %982 }
 0x3dd   :  { %v992_v32 = vsel %vm319_vm5, %v981_v35, %v983_v42  ;;  %1178 = vmatpush.msrb.mxu3 %v1034_v41 }
 0x3de   :  { %1159 = vmatpush.msrb.mxu2 %v992_v32 }
 0x3e3   :  { %v899_v43 = vpop.permute.xlu1 %898  ;;  %v985_v44 = vpop.permute.xlu2 %984 }
 0x3e4   :  { %v993_v45 = vsel %vm319_vm5, %v983_v42, %v985_v44  ;;  %v942_v46 = vpop.permute.xlu0 %941 }
 0x3e5   :  { %v951_v47 = vsel %vm272_vm3, %v940_v39, %v942_v46  ;;  %1179 = vmatpush.msrb.mxu3 %v993_v45 }
 0x3e6   :  { %1160 = vmatpush.msrb.mxu2 %v951_v47 }
 0x3eb   :  { %v1073_v48 = vpop.permute.xlu1 %1072  ;;  %v1867_v53 = vpop.permute.xlu2 %943 }
 0x3ec   :  { %1090 = vst.msk [vmem:[#allocation4 + $0x1a8] sm:$0xff] %vm630_vm12, %v1073_v48  ;;  %v952_v54 = vsel %vm272_vm3, %v942_v46, %v1867_v53  ;;  %v901_v59 = vpop.permute.xlu0 %900 }
 0x3ed   :  { %v910_v60 = vsel %vm224_vm2, %v899_v43, %v901_v59  ;;  %1180 = vmatpush.msrb.mxu3 %v952_v54 }
 0x3ee   :  { %1161 = vmatpush.msrb.mxu2 %v910_v60 }
 0x3f3   :  { %v860_v61 = vpop.permute.xlu1 %859  ;;  %v1071_v1 = vpop.permute.xlu2 %1070  ;;  %v1145_v41 = vld [vmem:[#allocation4 + $0x1a8] sm:$0xff] }
 0x3f4   :  { %v869_v2 = vsel %vm177_vm1, %v858_v29, %v860_v61  ;;  %v1078_v3 = vsel %vm414_vm7, %v1071_v1, %v1073_v48  ;;  %v1875_v4 = vpop.permute.xlu0 %902 }
 0x3f5   :  { %v911_v6 = vsel %vm224_vm2, %v901_v59, %v1875_v4  ;;  %1162 = vmatpush.msrb.mxu2 %v869_v2 }
 0x3f6   :  { %1181 = vmatpush.msrb.mxu3 %v911_v6 }
 0x3fb   :  { %v1069_v0 = vpop.permute.xlu1 %1068  ;;  %v1032_v51 = vpop.permute.xlu2 %1031 }
 0x3fc   :  { %v1076_v10 = vsel %vm414_vm7, %v1067_v8, %v1069_v0  ;;  %v1077_v11 = vsel %vm414_vm7, %v1069_v0, %v1071_v1  ;;  %1049 = vst.msk [vmem:[#allocation4 + $0x178] sm:$0xff] %vm630_vm12, %v1032_v51  ;;  %v1030_v13 = vpop.permute.xlu0 %1029 }
 0x3fd   :  { %v1037_v15 = vsel %vm367_vm4, %v1030_v13, %v1032_v51  ;;  %1197 = vmatpush.msra.mxu0 %v1076_v10  ;;  %1217 = vmatpush.msra.mxu1 %v1077_v11 }
 0x403   :  { %v819_v52 = vpop.permute.xlu1 %818  ;;  %v991_v16 = vpop.permute.xlu2 %990  ;;  %v1139_v42 = vld [vmem:[#allocation4 + $0x178] sm:$0xff] }
 0x404   :  { %v828_v17 = vsel %vm129_vm0, %v817_v30, %v819_v52  ;;  %1008 = vst.msk [vmem:[#allocation4 + $0x148] sm:$0xff] %vm630_vm12, %v991_v16  ;;  %v1885_v56 = vpop.permute.xlu0 %861 }
 0x405   :  { %v870_v18 = vsel %vm177_vm1, %v860_v61, %v1885_v56  ;;  %1163 = vmatpush.msrb.mxu2 %v828_v17  ;;  %v1097_v17 = vld [vmem:[#allocation4 + $0x28] sm:$0xff] }
 0x406   :  { %1182 = vmatpush.msrb.mxu3 %v870_v18 }
 0x40b   :  { %v1028_v19 = vpop.permute.xlu1 %1027  ;;  %v950_v58 = vpop.permute.xlu2 %949  ;;  %v1133_v46 = vld [vmem:[#allocation4 + $0x148] sm:$0xff] }
 0x40c   :  { %v1035_v12 = vsel %vm367_vm4, %v1026_v40, %v1028_v19  ;;  %v1036_v22 = vsel %vm367_vm4, %v1028_v19, %v1030_v13  ;;  %967 = vst.msk [vmem:[#allocation4 + $0x118] sm:$0xff] %vm630_vm12, %v950_v58  ;;  %v989_v23 = vpop.permute.xlu0 %988  ;;  %vm1146_vm4 = vcmask 588800  }
 0x40d   :  { %v996_v26 = vsel %vm319_vm5, %v989_v23, %v991_v16  ;;  %1198 = vmatpush.msra.mxu0 %v1035_v12  ;;  %1218 = vmatpush.msra.mxu1 %v1036_v22 }
 0x413   :  { %v778_v57 = vpop.permute.xlu1 %777  ;;  %v1893_v27 = vpop.permute.xlu2 %906  ;;  %v1127_v48 = vld [vmem:[#allocation4 + $0x118] sm:$0xff] }
 0x414   :  { %v787_v28 = vsel %vm81_vm8, %v1852_v31, %v778_v57  ;;  %v1897_v29 = vpop.permute.xlu0 %820 }
 0x415   :  { %v829_v30 = vsel %vm129_vm0, %v819_v52, %v1897_v29  ;;  %1164 = vmatpush.msrb.mxu2 %v787_v28 }
 0x416   :  { %1183 = vmatpush.msrb.mxu3 %v829_v30 }
 0x417   :  { %1165 = vmatpush.msrb.mxu2 %v1754_v14  ;;  %v1910_v14 = vld [vmem:[%s1999_s2] sm:$0xff] }
 0x418   :  { %1372 = vmatmul.msk.f32.vlgmr.msrb.gmra.mxu2 %vm1146_vm4, %v1910_v14 }
 0x419   :  { %1237 = vmatpush.msra.mxu2 %v1078_v3 }
 0x41b   :  { %1238 = vmatpush.msra.mxu2 %v1037_v15  ;;  %v987_v33 = vpop.permute.xlu1 %986  ;;  %v1902_v34 = vpop.permute.xlu2 %865 }
 0x41c   :  { %v994_v63 = vsel %vm319_vm5, %v985_v44, %v987_v33  ;;  %v995_v35 = vsel %vm319_vm5, %v987_v33, %v989_v23  ;;  %v948_v8 = vpop.permute.xlu0 %947 }
 0x41d   :  { %1239 = vmatpush.msra.mxu2 %v996_v26  ;;  %v955_v31 = vsel %vm272_vm3, %v948_v8, %v950_v58  ;;  %1199 = vmatpush.msra.mxu0 %v994_v63 }
 0x41e   :  { %1219 = vmatpush.msra.mxu1 %v995_v35 }
 0x41f   :  { %1240 = vmatpush.msra.mxu2 %v955_v31 }
 0x423   :  { %v909_v36 = vpop.permute.xlu1 %908  ;;  %v825_v37 = vpop.permute.xlu2 %824 }
 0x424   :  { %v914_v38 = vsel %vm224_vm2, %v1893_v27, %v909_v36  ;;  %926 = vst.msk [vmem:[#allocation4 + $0xe8] sm:$0xff] %vm630_vm12, %v909_v36  ;;  %v780_v39 = vpop.permute.xlu0 %779 }
 0x425   :  { %v788_v40 = vsel %vm81_vm8, %v778_v57, %v780_v39  ;;  %1241 = vmatpush.msra.mxu2 %v914_v38 }
 0x426   :  { %1184 = vmatpush.msrb.mxu3 %v788_v40 }
 0x428   :  { %1185 = vmatpush.msrb.mxu3 %v1757_v20 }
 0x429   :  { %1373 = vmatmul.msk.f32.vlgmr.msrb.gmra.mxu3 %vm1146_vm4, %v1910_v14 }
 0x42a   :  { %1257 = vmatpush.msra.mxu3 %v1145_v41 }
 0x42b   :  { %v868_v32 = vpop.permute.xlu1 %867  ;;  %v784_v43 = vpop.permute.xlu2 %783  ;;  %v1121_v54 = vld [vmem:[#allocation4 + $0xe8] sm:$0xff] }
 0x42c   :  { %1258 = vmatpush.msra.mxu3 %v1139_v42  ;;  %v873_v44 = vsel %vm177_vm1, %v1902_v34, %v868_v32  ;;  %885 = vst.msk [vmem:[#allocation4 + $0xb8] sm:$0xff] %vm630_vm12, %v868_v32  ;;  %v946_v45 = vpop.permute.xlu0 %945 }
 0x42d   :  { %v953_v47 = vsel %vm272_vm3, %v1867_v53, %v946_v45  ;;  %v954_v20 = vsel %vm272_vm3, %v946_v45, %v948_v8  ;;  %1242 = vmatpush.msra.mxu2 %v873_v44 }
 0x42e   :  { %1259 = vmatpush.msra.mxu3 %v1133_v46  ;;  %1200 = vmatpush.msra.mxu0 %v953_v47 }
 0x42f   :  { %1220 = vmatpush.msra.mxu1 %v954_v20 }
 0x430   :  { %1260 = vmatpush.msra.mxu3 %v1127_v48 }
 0x432   :  { %1261 = vmatpush.msra.mxu3 %v1121_v54 }
 0x433   :  { %v827_v59 = vpop.permute.xlu1 %826  ;;  %v782_v60 = vpop.permute.xlu2 %781  ;;  %v1115_v61 = vld [vmem:[#allocation4 + $0xb8] sm:$0xff] }
 0x434   :  { %v832_v1 = vsel %vm129_vm0, %v825_v37, %v827_v59  ;;  %844 = vst.msk [vmem:[#allocation4 + $0x88] sm:$0xff] %vm630_vm12, %v827_v59  ;;  %v789_v2 = vsel %vm81_vm8, %v780_v39, %v782_v60  ;;  %v790_v53 = vsel %vm81_vm8, %v782_v60, %v784_v43  ;;  %v905_v3 = vpop.permute.xlu0 %904  ;;  %1262 = vmatpush.msra.mxu3 %v1115_v61 }
 0x435   :  { %v912_v6 = vsel %vm224_vm2, %v1875_v4, %v905_v3  ;;  %v913_v0 = vsel %vm224_vm2, %v905_v3, %v1893_v27  ;;  %1243 = vmatpush.msra.mxu2 %v832_v1 }
 0x436   :  { %1201 = vmatpush.msra.mxu0 %v912_v6  ;;  %1221 = vmatpush.msra.mxu1 %v913_v0 }
 0x43b   :  { %v786_v51 = vpop.permute.xlu1 %785  ;;  %v1109_v10 = vld [vmem:[#allocation4 + $0x88] sm:$0xff] }
 0x43c   :  { %v791_v11 = vsel %vm81_vm8, %v784_v43, %v786_v51  ;;  %803 = vst.msk [vmem:[#allocation4 + $0x58] sm:$0xff] %vm630_vm12, %v786_v51  ;;  %v864_v13 = vpop.permute.xlu0 %863  ;;  %1263 = vmatpush.msra.mxu3 %v1109_v10 }
 0x43d   :  { %v871_v15 = vsel %vm177_vm1, %v1885_v56, %v864_v13  ;;  %v872_v4 = vsel %vm177_vm1, %v864_v13, %v1902_v34  ;;  %1244 = vmatpush.msra.mxu2 %v791_v11 }
 0x43e   :  { %1202 = vmatpush.msra.mxu0 %v871_v15  ;;  %1222 = vmatpush.msra.mxu1 %v872_v4 }
 0x43f   :  { %1245 = vmatpush.msra.mxu2 %v1778_v25 }
 0x440   :  { %1376 = vmatmul.msk.f32.vlgmr.msra.gmra.mxu2 %vm1146_vm4, %v1910_v14 }
 0x443   :  { %v1103_v52 = vld [vmem:[#allocation4 + $0x58] sm:$0xff] }
 0x444   :  { %1264 = vmatpush.msra.mxu3 %v1103_v52  ;;  %v823_v16 = vpop.permute.xlu0 %822 }
 0x445   :  { %v830_v18 = vsel %vm129_vm0, %v1897_v29, %v823_v16  ;;  %v831_v56 = vsel %vm129_vm0, %v823_v16, %v825_v37 }
 0x446   :  { %1265 = vmatpush.msra.mxu3 %v1097_v17  ;;  %1203 = vmatpush.msra.mxu0 %v830_v18 }
 0x447   :  { %1223 = vmatpush.msra.mxu1 %v831_v56  ;;  %1377 = vmatmul.msk.f32.vlgmr.msra.gmra.mxu3 %vm1146_vm4, %v1910_v14 }
 0x448   :  { %1204 = vmatpush.msra.mxu0 %v789_v2 }
 0x449   :  { %1224 = vmatpush.msra.mxu1 %v790_v53  ;;  %v1416_v53 = vmov 3  }
 0x44a   :  { %1205 = vmatpush.msra.mxu0 %v1766_v21  ;;  %1397 = vset.pattern.permute.xlu0 %v1416_v53 }
 0x44b   :  { %1225 = vmatpush.msra.mxu1 %v1775_v24  ;;  %1374 = vmatmul.msk.f32.vlgmr.msra.gmra.mxu0 %vm1146_vm4, %v1910_v14 }
 0x44c   :  { %1375 = vmatmul.msk.f32.vlgmr.msra.gmra.mxu1 %vm1146_vm4, %v1910_v14 }
 0x49b   :  { %v1955_v25 = vpop.f32.mrf.mxu2 }
 0x49c   :  { %v1271_v58 = vmul.f32 %v1955_v25, %v1700_v49 }
 0x49e   :  { %v1285_v21 = vmul.f32 %v1271_v58, %v1955_v25 }
 0x4ac   :  { %v1957_v19 = vpop.f32.mrf.mxu3 }
 0x4ad   :  { %v1272_v12 = vmul.f32 %v1957_v19, %v1702_v50 }
 0x4af   :  { %v1286_v24 = vmul.f32 %v1272_v12, %v1957_v19  ;;  %v1277_v26 = vadd.f32 %v1272_v12, %v1271_v58 }
 0x4b1   :  { %v1291_v28 = vadd.f32 %v1286_v24, %v1285_v21 }
 0x4c3   :  { %v1247_v23 = vpop.f32.mrf.mxu2 }
 0x4c4   :  { %v1275_v49 = vmul.f32 %v1247_v23, %v1726_v9 }
 0x4c6   :  { %v1289_v37 = vmul.f32 %v1275_v49, %v1247_v23 }
 0x4c8   :  { %v1207_v22 = vpop.f32.mrf.mxu0 }
 0x4c9   :  { %v1273_v57 = vmul.f32 %v1207_v22, %v1712_v55  ;;  %v1227_v27 = vpop.f32.mrf.mxu1 }
 0x4ca   :  { %v1274_v29 = vmul.f32 %v1227_v27, %v1720_v62  ;;  %v1267_v30 = vpop.f32.mrf.mxu3 }
 0x4cb   :  { %v1278_v33 = vadd.f32 %v1277_v26, %v1273_v57  ;;  %v1287_v34 = vmul.f32 %v1273_v57, %v1207_v22  ;;  %v1276_v50 = vmul.f32 %v1267_v30, %v1724_v5  ;;  %v1415_v5 = vmov 2  }
 0x4cc   :  { %v1288_v8 = vmul.f32 %v1274_v29, %v1227_v27  ;;  %1395 = vset.pattern.permute.xlu2 %v1415_v5 }
 0x4cd   :  { %v1292_v63 = vadd.f32 %v1291_v28, %v1287_v34  ;;  %v1279_v35 = vadd.f32 %v1278_v33, %v1274_v29  ;;  %v1290_v31 = vmul.f32 %v1276_v50, %v1267_v30  ;;  %v1281_v14 = vsel %vm630_vm12, %v1276_v50, 0.0 }
 0x4cf   :  { %v1293_v36 = vadd.f32 %v1292_v63, %v1288_v8  ;;  %v1280_v55 = vadd.f32 %v1279_v35, %v1275_v49  ;;  %v1295_v62 = vsel %vm630_vm12, %v1290_v31, 0.0 }
 0x4d1   :  { %v1282_v38 = vadd.f32 %v1281_v14, %v1280_v55  ;;  %v1294_v39 = vadd.f32 %v1293_v36, %v1289_v37 }
 0x4d3   :  { %1283 = vadd.xlane.f32.xlu1 %v1282_v38  ;;  %v1296_v40 = vadd.f32 %v1295_v62, %v1294_v39 }
 0x4d5   :  { %1297 = vadd.xlane.f32.xlu0 %v1296_v40 }
 0x546   :  { %v1284_v41 = vpop.xlane.xlu1 %1283 }
 0x547   :  { %v1299_v9 = vmul.f32 0.001953125, %v1284_v41 }
 0x548   :  { %v1298_v42 = vpop.xlane.xlu0 %1297 }
 0x549   :  { %v1301_v32 = vmul.f32 %v1299_v9, %v1299_v9  ;;  %v1300_v43 = vmul.f32 0.001953125, %v1298_v42 }
 0x54b   :  { %v1302_v44 = vsub.f32 %v1300_v43, %v1301_v32 }
 0x54d   :  { %v1303_v45 = vmax.f32 %v1302_v44, 0.0 }
 0x54f   :  { %v1304_v46 = vadd.f32 1e-05, %v1303_v45 }
 0x551   :  { %1400 = vrsqrt.f32 %v1304_v46  ;;  %vm1311_vm1 = vweird.f32 %v1304_v46 }
 0x557   :  { %v1401_v47 = vpop.eup %1400 }
 0x558   :  { %v1306_v20 = vmul.f32 %v1401_v47, %v1304_v46  ;;  %vm1312_vm0 = vweird.f32 %v1401_v47 }
 0x559   :  { %vm1313_vm2 = vmor %vm1311_vm1, %vm1312_vm0 }
 0x55a   :  { %v1307_v48 = vmul.f32 %v1401_v47, %v1306_v20 }
 0x55c   :  { %v1308_v54 = vmul.f32 0.5, %v1307_v48 }
 0x55e   :  { %v1309_v59 = vsub.f32 1.5, %v1308_v54 }
 0x560   :  { %v1310_v60 = vmul.f32 %v1401_v47, %v1309_v59 }
 0x562   :  { %v1314_v61 = vsel %vm1313_vm2, %v1401_v47, %v1310_v60 }
 0x563   :  { %v1315_v1 = vmul.f32 %v1314_v61, %v1739_v7 }
 0x565   :  { %v1316_v2 = vmul.f32 %v1315_v1, %v1299_v9 }
 0x567   :  { %1318 = vrot.lane.b32.xlu2 %v1316_v2, %s1411_s10 }
 0x56f   :  { %1324 = vperm.xlu2 %1395, %v1315_v1  }
 0x577   :  { %1396 = vset.pattern.permute.xlu2 %v1416_v53 }
 0x5c1   :  { %v1319_v3 = vpop.permute.xlu2 %1318 }
 0x5c2   :  { %v1321_v6 = vsub.f32 %v1739_v7, %v1319_v3 }
 0x5c4   :  { %1335 = vperm.xlu2 %1396, %v1321_v6  }
 0x5c9   :  { %v1325_v0 = vpop.permute.xlu2 %1324 }
 0x5ca   :  { %v1327_v51 = vmul.f32 %v1325_v0, %v1955_v25  ;;  %v1328_v10 = vmul.f32 %v1325_v0, %v1957_v19  ;;  %v1329_v11 = vmul.f32 %v1325_v0, %v1207_v22  ;;  %v1330_v13 = vmul.f32 %v1325_v0, %v1227_v27 }
 0x5cb   :  { %v1331_v15 = vmul.f32 %v1325_v0, %v1247_v23  ;;  %v1332_v4 = vmul.f32 %v1325_v0, %v1267_v30 }
 0x61e   :  { %v1336_v52 = vpop.permute.xlu2 %1335 }
 0x61f   :  { %v1338_v16 = vadd.f32 %v1336_v52, %v1327_v51  ;;  %v1339_v17 = vadd.f32 %v1336_v52, %v1328_v10  ;;  %v1340_v18 = vadd.f32 %v1336_v52, %v1329_v11  ;;  %v1341_v56 = vadd.f32 %v1336_v52, %v1330_v13 }
 0x620   :  { %v1342_v58 = vadd.f32 %v1336_v52, %v1331_v15  ;;  %v1343_v12 = vadd.f32 %v1336_v52, %v1332_v4 }
 0x621   :  { %v1344_v21 = vmax.f32 %v1338_v16, 0.0  ;;  %v1345_v24 = vmax.f32 %v1339_v17, 0.0  ;;  %v1346_v7 = vmax.f32 %v1340_v18, 0.0  ;;  %v1347_v26 = vmax.f32 %v1341_v56, 0.0 }
 0x622   :  { %v1348_v57 = vmax.f32 %v1342_v58, 0.0  ;;  %v1349_v25 = vmax.f32 %v1343_v12, 0.0 }
 0x623   :  { %1350 = vst [vmem:[%s2000_s5] sm:$0xff] %v1344_v21 }
 0x624   :  { %1351 = vst [vmem:[%s2000_s5 + $0x8] sm:$0xff] %v1345_v24 }
 0x625   :  { %1352 = vst [vmem:[%s2000_s5 + $0x10] sm:$0xff] %v1346_v7 }
 0x626   :  { %1353 = vst [vmem:[%s2000_s5 + $0x18] sm:$0xff] %v1347_v26 }
 0x627   :  { %1354 = vst [vmem:[%s2000_s5 + $0x20] sm:$0xff] %v1348_v57 }
 0x628   :  { %1355 = vst.msk [vmem:[%s2000_s5 + $0x28] sm:$0xff] %vm630_vm12, %v1349_v25 }

</bundles_post_ra>
